<compile_context>
chip_gen: v7x
topology: tpu7x:2x2x1
jax: 0.10.0
libtpu: 0.0.40
codegen_flags: <defaults>
</compile_context>

<pallas_src>
import functools

import jax
import jax.numpy as jnp
from jax.experimental import pallas as pl
from jax.experimental.pallas import tpu as pltpu

# Small, module-consistent dims (gpt2-style: mlp_hidden = 4 * n_embd).
N_EMBD = 128
MLP_HIDDEN = 4 * N_EMBD  # 512

_K0 = 0.7978845608028654            # sqrt(2/pi)
_K1 = _K0 * 0.044715                # folded cubic coefficient


def _tanh_gelu(h):
    # 0.5*h*(1 + tanh(K0*(h + 0.044715*h^3)))  ==  hh + hh*tanh(h*(K0 + K1*h*h))
    # (constants folded: ~2 fewer multiplies per element on the VALU-bound hidden)
    u = h * h
    arg = h * (_K0 + _K1 * u)
    hh = 0.5 * h
    return hh + hh * jnp.tanh(arg)


def _mlp_kernel(x_ref, fcw_ref, fcb_ref, pjw_ref, pjb_ref, o_ref, *, gelu_in_bf16):
    # x_ref:  (tm, C)  f32   row-tile of activations
    # fcw_ref:(C, H)   bf16  VMEM-resident fc weight
    # fcb_ref:(1, H)   f32   fc bias
    # pjw_ref:(H, C)   bf16  VMEM-resident proj weight
    # pjb_ref:(1, C)   f32   proj bias
    # o_ref:  (tm, C)  f32
    x = x_ref[...]

    # fc: bf16 MXU inputs, f32 accumulation; bias add in f32.
    h = jnp.dot(x.astype(jnp.bfloat16), fcw_ref[...],
                preferred_element_type=jnp.float32)
    h = h + fcb_ref[...]

    if gelu_in_bf16:
        # v6e/v7x: bf16 VPU/EUP -> half the VALU/EUP work and VMEM traffic on
        # the (tm, 4C) hidden; the value is cast to bf16 before the MXU anyway.
        g = _tanh_gelu(h.astype(jnp.bfloat16))
    else:
        # v5e: no bf16 VPU/EUP -> keep the polynomial in f32, cast once at the end.
        g = _tanh_gelu(h).astype(jnp.bfloat16)

    # proj: bf16 MXU inputs, f32 accumulation.
    y = jnp.dot(g, pjw_ref[...], preferred_element_type=jnp.float32)
    o_ref[...] = (y + pjb_ref[...]).astype(o_ref.dtype)


def _round_up(x, m):
    return (x + m - 1) // m * m


def _choose_tiling(m):
    """Return (row_tile, padded_M).

    Prefer big (512-row) tiles to amortize the ~0.35 us/grid-step overhead and
    the MXU fill/drain (K=N=128 only half-fills a 256x256 MXU), but keep the
    grid >= 2 iterations whenever M is large enough so the two v7x TensorCores
    both get work. Ragged M is padded rather than shrinking the tile.
    """
    if m >= 1024:
        tm = 512
    elif m >= 512:
        tm = 256
    elif m >= 128:
        tm = _round_up(m, 16) // 2      # two tiles -> both TCs busy on v7x
    else:
        tm = max(8, _round_up(m, 8))    # tiny M: single full-extent block
    return tm, _round_up(m, tm)


def _device_kind():
    try:
        return jax.devices()[0].device_kind.lower()
    except Exception:
        return ""


def gpt_mlp(x, fc_w, fc_b, proj_w, proj_b):
    """x: (B, T, C) f32; fc_w: (C, H) [ideally bf16]; fc_b: (H,);
    proj_w: (H, C) [ideally bf16]; proj_b: (C,)."""
    B, T, C = x.shape
    H = fc_w.shape[1]
    M = B * T
    x2 = x.reshape(M, C)

    tm, m_pad = _choose_tiling(M)
    if m_pad != M:
        x2 = jnp.pad(x2, ((0, m_pad - M), (0, 0)))
    grid = (m_pad // tm,)

    # Callers should pass bf16 weights (cast once, outside any jit). The cast
    # below is only a fallback so the MXU still sees bf16 inputs.
    if fc_w.dtype != jnp.bfloat16:
        fc_w = fc_w.astype(jnp.bfloat16)
    if proj_w.dtype != jnp.bfloat16:
        proj_w = proj_w.astype(jnp.bfloat16)
    fc_b2 = fc_b.reshape(1, H).astype(jnp.float32)
    proj_b2 = proj_b.reshape(1, C).astype(jnp.float32)

    kind = _device_kind()
    gelu_in_bf16 = not any(v in kind for v in ("v2", "v3", "v4", "v5"))

    # VMEM budget from actual operand sizes + headroom for Mosaic internal
    # scratch, capped per generation (v7x: 64 MiB physical per TensorCore).
    need = (2 * tm * C * 4            # x row-tile, f32, double-buffered
            + 2 * tm * C * 4          # out row-tile, f32, double-buffered
            + C * H * 2 + H * 4       # fc_w (bf16, single buffer) + fc_b (f32)
            + H * C * 2 + C * 4       # proj_w (bf16, single buffer) + proj_b
            + tm * H * 6              # in-kernel f32 hidden + bf16 GELU copy
            + tm * C * 6)             # in-kernel bf16 x copy + f32 y
    cap = (48 << 20) if "v7" in kind else (96 << 20)
    vmem_limit = int(min(cap, max(need + (8 << 20), 16 << 20)))

    kernel = functools.partial(_mlp_kernel, gelu_in_bf16=gelu_in_bf16)
    out_shape = jax.ShapeDtypeStruct((m_pad, C), x.dtype)
    cparams = pltpu.CompilerParams(
        dimension_semantics=("parallel",),
        vmem_limit_bytes=vmem_limit,
    )
    out_spec = pl.BlockSpec((tm, C), lambda i: (i, 0))

    def build(single_buffer_consts):
        pm = {"pipeline_mode": pl.Buffered(1)} if single_buffer_consts else {}
        in_specs = [
            pl.BlockSpec((tm, C), lambda i: (i, 0)),          # x row-tile
            pl.BlockSpec((C, H), lambda i: (0, 0), **pm),     # fc_w (resident)
            pl.BlockSpec((1, H), lambda i: (0, 0), **pm),     # fc_b
            pl.BlockSpec((H, C), lambda i: (0, 0), **pm),     # proj_w (resident)
            pl.BlockSpec((1, C), lambda i: (0, 0), **pm),     # proj_b
        ]
        return pl.pallas_call(
            kernel,
            grid_spec=pl.GridSpec(grid=grid, in_specs=in_specs, out_specs=out_spec),
            out_shape=out_shape,
            compiler_params=cparams,
        )

    args = (x2, fc_w, fc_b2, proj_w, proj_b2)
    try:
        out = build(True)(*args)
    except Exception:
        # Older JAX builds without pipeline_mode / Buffered(1): default buffering.
        out = build(False)(*args)

    return out[:M].reshape(B, T, C)


if __name__ == "__main__":
    key = jax.random.PRNGKey(0)
    kx, k1, k2, k3, k4 = jax.random.split(key, 5)

    batch, seq = 2, 64
    scale = 0.02
    x = jax.random.normal(kx, (batch, seq, N_EMBD), jnp.float32)
    fc_w = scale * jax.random.normal(k1, (N_EMBD, MLP_HIDDEN), jnp.float32)
    fc_b = scale * jax.random.normal(k2, (MLP_HIDDEN,), jnp.float32)
    proj_w = scale * jax.random.normal(k3, (MLP_HIDDEN, N_EMBD), jnp.float32)
    proj_b = scale * jax.random.normal(k4, (N_EMBD,), jnp.float32)

    # Hoisted one-time bf16 weight cast (per review: no per-call convert inside
    # the wrapper / under jit).
    fc_w_bf = jax.block_until_ready(fc_w.astype(jnp.bfloat16))
    proj_w_bf = jax.block_until_ready(proj_w.astype(jnp.bfloat16))

    y = jax.block_until_ready(gpt_mlp(x, fc_w_bf, fc_b, proj_w_bf, proj_b))

    # True f32 reference (matches the PyTorch module: fc -> GELU(tanh) -> proj).
    def ref(x, fc_w, fc_b, proj_w, proj_b):
        x2 = x.reshape(-1, N_EMBD)
        h = x2 @ fc_w + fc_b
        h = 0.5 * h * (1.0 + jnp.tanh(_K0 * (h + 0.044715 * h * h * h)))
        o = h @ proj_w + proj_b
        return o.reshape(x.shape)

    y_ref = ref(x, fc_w, fc_b, proj_w, proj_b)

    assert y.shape == (batch, seq, N_EMBD)
    assert y.dtype == jnp.float32
    assert bool(jnp.all(jnp.isfinite(y)))
    assert bool(jnp.max(jnp.abs(y - y_ref)) < 1e-2)
    print("KERNEL_OK")
</pallas_src>

<mosaic_0001>
module attributes {stable_mosaic.version = 11 : i64} {
  func.func @_mlp_kernel(%arg0: i32, %arg1: memref<64x128xf32, #tpu.memory_space<vmem>>, %arg2: memref<128x512xbf16, #tpu.memory_space<vmem>>, %arg3: memref<1x512xf32, #tpu.memory_space<vmem>>, %arg4: memref<512x128xbf16, #tpu.memory_space<vmem>>, %arg5: memref<1x128xf32, #tpu.memory_space<vmem>>, %arg6: memref<64x128xf32, #tpu.memory_space<vmem>>) attributes {dimension_semantics = [#tpu.dimension_semantics<parallel>], iteration_bounds = array<i64: 2>, scalar_prefetch = 0 : i64, scratch_operands = 0 : i64, tpu.core_type = #tpu.core_type<tc>, window_params = [{transform_indices = @transform_0, window_bounds = array<i64: 64, 128>}, {pipeline_mode = #tpu.pipeline_mode<synchronous>, transform_indices = @transform_1, window_bounds = array<i64: 128, 512>}, {pipeline_mode = #tpu.pipeline_mode<synchronous>, transform_indices = @transform_2, window_bounds = array<i64: 1, 512>}, {pipeline_mode = #tpu.pipeline_mode<synchronous>, transform_indices = @transform_3, window_bounds = array<i64: 512, 128>}, {pipeline_mode = #tpu.pipeline_mode<synchronous>, transform_indices = @transform_4, window_bounds = array<i64: 1, 128>}, {transform_indices = @transform_5, window_bounds = array<i64: 64, 128>}]} {
    %c0 = arith.constant 0 : index
    %c0_0 = arith.constant 0 : index
    %0 = vector.load %arg1[%c0, %c0_0] : memref<64x128xf32, #tpu.memory_space<vmem>>, vector<64x128xf32>
    %1 = arith.truncf %0 : vector<64x128xf32> to vector<64x128xbf16>
    %c0_1 = arith.constant 0 : index
    %c0_2 = arith.constant 0 : index
    %2 = vector.load %arg2[%c0_1, %c0_2] : memref<128x512xbf16, #tpu.memory_space<vmem>>, vector<128x512xbf16>
    %cst = arith.constant dense<0.000000e+00> : vector<64x512xf32>
    %3 = tpu.matmul %1, %2, %cst {dimension_numbers = #tpu.dot_dimension_numbers<[1], [0], [0], [1], [0, 0, 1, 1], [], []>} : vector<64x128xbf16>, vector<128x512xbf16>, vector<64x512xf32> -> vector<64x512xf32>
    %c0_3 = arith.constant 0 : index
    %c0_4 = arith.constant 0 : index
    %4 = vector.load %arg3[%c0_3, %c0_4] : memref<1x512xf32, #tpu.memory_space<vmem>>, vector<1x512xf32>
    %5 = vector.broadcast %4 : vector<1x512xf32> to vector<64x512xf32>
    %6 = arith.addf %3, %5 : vector<64x512xf32>
    %7 = arith.truncf %6 : vector<64x512xf32> to vector<64x512xbf16>
    %8 = arith.mulf %7, %7 : vector<64x512xbf16>
    %cst_5 = arith.constant 3.564450e-02 : bf16
    %9 = vector.broadcast %cst_5 : bf16 to vector<64x512xbf16>
    %10 = arith.mulf %9, %8 : vector<64x512xbf16>
    %cst_6 = arith.constant 7.968750e-01 : bf16
    %11 = vector.broadcast %cst_6 : bf16 to vector<64x512xbf16>
    %12 = arith.addf %11, %10 : vector<64x512xbf16>
    %13 = arith.mulf %7, %12 : vector<64x512xbf16>
    %cst_7 = arith.constant 5.000000e-01 : bf16
    %14 = vector.broadcast %cst_7 : bf16 to vector<64x512xbf16>
    %15 = arith.mulf %14, %7 : vector<64x512xbf16>
    %16 = math.tanh %13 : vector<64x512xbf16>
    %17 = arith.mulf %15, %16 : vector<64x512xbf16>
    %18 = arith.addf %15, %17 : vector<64x512xbf16>
    %c0_8 = arith.constant 0 : index
    %c0_9 = arith.constant 0 : index
    %19 = vector.load %arg4[%c0_8, %c0_9] : memref<512x128xbf16, #tpu.memory_space<vmem>>, vector<512x128xbf16>
    %cst_10 = arith.constant dense<0.000000e+00> : vector<64x128xf32>
    %20 = tpu.matmul %18, %19, %cst_10 {dimension_numbers = #tpu.dot_dimension_numbers<[1], [0], [0], [1], [0, 0, 1, 1], [], []>} : vector<64x512xbf16>, vector<512x128xbf16>, vector<64x128xf32> -> vector<64x128xf32>
    %c0_11 = arith.constant 0 : index
    %c0_12 = arith.constant 0 : index
    %21 = vector.load %arg5[%c0_11, %c0_12] : memref<1x128xf32, #tpu.memory_space<vmem>>, vector<1x128xf32>
    %22 = vector.broadcast %21 : vector<1x128xf32> to vector<64x128xf32>
    %23 = arith.addf %20, %22 : vector<64x128xf32>
    %c0_13 = arith.constant 0 : index
    %c0_14 = arith.constant 0 : index
    %24 = vector.load %arg6[%c0_13, %c0_14] : memref<64x128xf32, #tpu.memory_space<vmem>>, vector<64x128xf32>
    tpu.vector_store %arg6[%c0_13, %c0_14], %23 {strides = array<i32>} : memref<64x128xf32, #tpu.memory_space<vmem>>, vector<64x128xf32>,
    return
  }
  func.func @transform_0(%arg0: i32) -> (i32, i32) {
    %c0_i32 = arith.constant 0 : i32
    %c0_i32_0 = arith.constant 0 : i32
    return %arg0, %c0_i32 : i32, i32
  }
  func.func @transform_1(%arg0: i32) -> (i32, i32) {
    %c0_i32 = arith.constant 0 : i32
    %c0_i32_0 = arith.constant 0 : i32
    %c0_i32_1 = arith.constant 0 : i32
    return %c0_i32, %c0_i32_0 : i32, i32
  }
  func.func @transform_2(%arg0: i32) -> (i32, i32) {
    %c0_i32 = arith.constant 0 : i32
    %c0_i32_0 = arith.constant 0 : i32
    %c0_i32_1 = arith.constant 0 : i32
    return %c0_i32, %c0_i32_0 : i32, i32
  }
  func.func @transform_3(%arg0: i32) -> (i32, i32) {
    %c0_i32 = arith.constant 0 : i32
    %c0_i32_0 = arith.constant 0 : i32
    %c0_i32_1 = arith.constant 0 : i32
    return %c0_i32, %c0_i32_0 : i32, i32
  }
  func.func @transform_4(%arg0: i32) -> (i32, i32) {
    %c0_i32 = arith.constant 0 : i32
    %c0_i32_0 = arith.constant 0 : i32
    %c0_i32_1 = arith.constant 0 : i32
    return %c0_i32, %c0_i32_0 : i32, i32
  }
  func.func @transform_5(%arg0: i32) -> (i32, i32) {
    %c0_i32 = arith.constant 0 : i32
    %c0_i32_0 = arith.constant 0 : i32
    return %arg0, %c0_i32 : i32, i32
  }
}

module attributes {stable_mosaic.version = 11 : i64} {
  func.func @_mlp_kernel(%arg0: i32, %arg1: memref<64x128xf32, #tpu.memory_space<vmem>>, %arg2: memref<128x512xbf16, #tpu.memory_space<vmem>>, %arg3: memref<1x512xf32, #tpu.memory_space<vmem>>, %arg4: memref<512x128xbf16, #tpu.memory_space<vmem>>, %arg5: memref<1x128xf32, #tpu.memory_space<vmem>>, %arg6: memref<64x128xf32, #tpu.memory_space<vmem>>) attributes {dimension_semantics = [#tpu.dimension_semantics<parallel>], iteration_bounds = array<i64: 2>, scalar_prefetch = 0 : i64, scratch_operands = 0 : i64, tpu.core_type = #tpu.core_type<tc>, window_params = [{transform_indices = @transform_0, window_bounds = array<i64: 64, 128>}, {pipeline_mode = #tpu.pipeline_mode<synchronous>, transform_indices = @transform_1, window_bounds = array<i64: 128, 512>}, {pipeline_mode = #tpu.pipeline_mode<synchronous>, transform_indices = @transform_2, window_bounds = array<i64: 1, 512>}, {pipeline_mode = #tpu.pipeline_mode<synchronous>, transform_indices = @transform_3, window_bounds = array<i64: 512, 128>}, {pipeline_mode = #tpu.pipeline_mode<synchronous>, transform_indices = @transform_4, window_bounds = array<i64: 1, 128>}, {transform_indices = @transform_5, window_bounds = array<i64: 64, 128>}]} {
    %c0 = arith.constant 0 : index
    %c0_0 = arith.constant 0 : index
    %0 = vector.load %arg1[%c0, %c0_0] : memref<64x128xf32, #tpu.memory_space<vmem>>, vector<64x128xf32>
    %1 = arith.truncf %0 : vector<64x128xf32> to vector<64x128xbf16>
    %c0_1 = arith.constant 0 : index
    %c0_2 = arith.constant 0 : index
    %2 = vector.load %arg2[%c0_1, %c0_2] : memref<128x512xbf16, #tpu.memory_space<vmem>>, vector<128x512xbf16>
    %cst = arith.constant dense<0.000000e+00> : vector<64x512xf32>
    %3 = tpu.matmul %1, %2, %cst {dimension_numbers = #tpu.dot_dimension_numbers<[1], [0], [0], [1], [0, 0, 1, 1], [], []>} : vector<64x128xbf16>, vector<128x512xbf16>, vector<64x512xf32> -> vector<64x512xf32>
    %c0_3 = arith.constant 0 : index
    %c0_4 = arith.constant 0 : index
    %4 = vector.load %arg3[%c0_3, %c0_4] : memref<1x512xf32, #tpu.memory_space<vmem>>, vector<1x512xf32>
    %5 = vector.broadcast %4 : vector<1x512xf32> to vector<64x512xf32>
    %6 = arith.addf %3, %5 : vector<64x512xf32>
    %7 = arith.truncf %6 : vector<64x512xf32> to vector<64x512xbf16>
    %8 = arith.mulf %7, %7 : vector<64x512xbf16>
    %cst_5 = arith.constant 3.564450e-02 : bf16
    %9 = vector.broadcast %cst_5 : bf16 to vector<64x512xbf16>
    %10 = arith.mulf %9, %8 : vector<64x512xbf16>
    %cst_6 = arith.constant 7.968750e-01 : bf16
    %11 = vector.broadcast %cst_6 : bf16 to vector<64x512xbf16>
    %12 = arith.addf %11, %10 : vector<64x512xbf16>
    %13 = arith.mulf %7, %12 : vector<64x512xbf16>
    %cst_7 = arith.constant 5.000000e-01 : bf16
    %14 = vector.broadcast %cst_7 : bf16 to vector<64x512xbf16>
    %15 = arith.mulf %14, %7 : vector<64x512xbf16>
    %16 = math.tanh %13 : vector<64x512xbf16>
    %17 = arith.mulf %15, %16 : vector<64x512xbf16>
    %18 = arith.addf %15, %17 : vector<64x512xbf16>
    %c0_8 = arith.constant 0 : index
    %c0_9 = arith.constant 0 : index
    %19 = vector.load %arg4[%c0_8, %c0_9] : memref<512x128xbf16, #tpu.memory_space<vmem>>, vector<512x128xbf16>
    %cst_10 = arith.constant dense<0.000000e+00> : vector<64x128xf32>
    %20 = tpu.matmul %18, %19, %cst_10 {dimension_numbers = #tpu.dot_dimension_numbers<[1], [0], [0], [1], [0, 0, 1, 1], [], []>} : vector<64x512xbf16>, vector<512x128xbf16>, vector<64x128xf32> -> vector<64x128xf32>
    %c0_11 = arith.constant 0 : index
    %c0_12 = arith.constant 0 : index
    %21 = vector.load %arg5[%c0_11, %c0_12] : memref<1x128xf32, #tpu.memory_space<vmem>>, vector<1x128xf32>
    %22 = vector.broadcast %21 : vector<1x128xf32> to vector<64x128xf32>
    %23 = arith.addf %20, %22 : vector<64x128xf32>
    %c0_13 = arith.constant 0 : index
    %c0_14 = arith.constant 0 : index
    %24 = vector.load %arg6[%c0_13, %c0_14] : memref<64x128xf32, #tpu.memory_space<vmem>>, vector<64x128xf32>
    tpu.vector_store %arg6[%c0_13, %c0_14], %23 {strides = array<i32>} : memref<64x128xf32, #tpu.memory_space<vmem>>, vector<64x128xf32>,
    return
  }
  func.func @transform_0(%arg0: i32) -> (i32, i32) {
    %c0_i32 = arith.constant 0 : i32
    %c0_i32_0 = arith.constant 0 : i32
    return %arg0, %c0_i32 : i32, i32
  }
  func.func @transform_1(%arg0: i32) -> (i32, i32) {
    %c0_i32 = arith.constant 0 : i32
    %c0_i32_0 = arith.constant 0 : i32
    %c0_i32_1 = arith.constant 0 : i32
    return %c0_i32, %c0_i32_0 : i32, i32
  }
  func.func @transform_2(%arg0: i32) -> (i32, i32) {
    %c0_i32 = arith.constant 0 : i32
    %c0_i32_0 = arith.constant 0 : i32
    %c0_i32_1 = arith.constant 0 : i32
    return %c0_i32, %c0_i32_0 : i32, i32
  }
  func.func @transform_3(%arg0: i32) -> (i32, i32) {
    %c0_i32 = arith.constant 0 : i32
    %c0_i32_0 = arith.constant 0 : i32
    %c0_i32_1 = arith.constant 0 : i32
    return %c0_i32, %c0_i32_0 : i32, i32
  }
  func.func @transform_4(%arg0: i32) -> (i32, i32) {
    %c0_i32 = arith.constant 0 : i32
    %c0_i32_0 = arith.constant 0 : i32
    %c0_i32_1 = arith.constant 0 : i32
    return %c0_i32, %c0_i32_0 : i32, i32
  }
  func.func @transform_5(%arg0: i32) -> (i32, i32) {
    %c0_i32 = arith.constant 0 : i32
    %c0_i32_0 = arith.constant 0 : i32
    return %arg0, %c0_i32 : i32, i32
  }
}

</mosaic_0001>

<bundles_post_ra>
// kernel: tpu_custom_call.1
= control target key start
LH: loop header
LB: loop body
LE: loop exit
PB: predicated region body
PF: predicated region fallthrough
CT: control target
= control target key end

     0   :  { %10 = vsyncpa [#allocation3], 0  ;;  %s2286_s0 = inlined_call_operand.hbm [shape: f32[128,128], index: 0, kind: input, shape index: {}]   ;;  %s2287_s1 = inlined_call_operand.hbm [shape: bf16[128,512], index: 1, kind: input, shape index: {}]   ;;  %s2288_s2 = inlined_call_operand.vmem [shape: f32[1,512], index: 2, kind: input, shape index: {}]   ;;  %s2289_s3 = inlined_call_operand.hbm [shape: bf16[512,128], index: 3, kind: input, shape index: {}]   ;;  %s2290_s4 = inlined_call_operand.vmem [shape: f32[1,128], index: 4, kind: input, shape index: {}]   ;;  %s2291_s5 = inlined_call_operand.hbm [shape: f32[128,128], index: 5, kind: output, shape index: {}]  }
   0x1   :  { %12 = vsyncpa [#allocation3 + $0x1], 0 }
   0x2   :  { %13 = vsyncpa [#allocation6], 0 }
   0x3   :  { %14 = vsyncpa [#allocation4], 0 }
   0x4   :  { %16 = vsyncpa [#allocation4 + $0x1], 0  ;;  %s1855_s18 = smov 0   ;;  %s1857_s19 = smov 0  }
   0x5   :  { %s1859_s20 = smov 0   ;;  %s1861_s21 = smov 0  }
   0x6 LB: > { %s1876_s22 = sadd.s32 4294967295, %s1810_s21   ;;  %s1301_s23 = sadd.s32 4294967294, %s1810_s21   ;;  %s1810_s21 = sphi %s1861_s21, %s2311_s21   ;;  %s1806_s20 = sphi %s1859_s20, %s2310_s20   ;;  %s1802_s19 = sphi %s1857_s19, %s2309_s19   ;;  %s1798_s18 = sphi %s1855_s18, %s2308_s18  }
   0x7   : > { %p42_p0 = scmp.ne.s32.totalorder %s1802_s19, %s1798_s18  ;;  %p2292_p1 = scmp.eq.s32.totalorder %s1876_s22, 0 }
   0x8   : > { %p156_p3 = scmp.eq.s32.totalorder %s1301_s23, 1  ;;  %p1302_p5 = scmp.ge.s32.totalorder %s1810_s21, 1 }
   0x9   : > { %p1885_p4 = por %p2292_p1, %p42_p0  ;;  %p163_p7 = scmp.lt.s32.totalorder %s1810_s21, 3 }
   0xa   : > { %p1890_p6 = por %p156_p3, %p42_p0  ;;  %s1812_s27 = smov [#allocation5]  }
   0xb   : > { %s2295_s24 = scalar_select %p1885_p4, 1, 0 }
   0xc   : > { %s2296_s25 = scalar_select %p1890_p6, 1, 0 }
   0xd   : > { %p1895_p8 = pnand %p1302_p5, %p163_p7  ;;  %s175_s28 = sshll.u32 %s1812_s27, 4  ;;  %s1899_s28 = int_to_ptr.vmem [resolvable:$true] %s175_s28 }
   0xe   : > { %s1813_s30 = smov [#allocation7]   ;;  %s1654_s9 = scalar_lea.hbm %s2287_s1, 4096 }
   0xf   : > { %p1478_p9 = pneg %p1895_p8  ;;  %s191_s6 = sshll.u32 %s1813_s30, 4  ;;  %s1910_s6 = int_to_ptr.vmem [resolvable:$true] %s191_s6 }
  0x10   : > { %p1655_p12 = scmp.ne.s32.totalorder %s2287_s1, %s1654_s9  ;;  %p1661_p5 = scmp.lt.u32.totalorder %s1654_s9, %s2287_s1 }
  0x11   : > { %p1906_p11 = pnand %p1478_p9, %p2292_p1 }
  0x13   : > { %p1656_p13 = pneg %p1906_p11 }
  0x15   : > { %p1657_p0 = pnand %p1656_p13, %p1655_p12 }
  0x17   : > { %p1658_p3 = pneg %p1657_p0 }
  0x19   : > { %p1663_p7 = pnand %p1661_p5, %p1658_p3 }
  0x1b   : > { %1666 = shalt.err (!%p1663_p7)
}
  0x1c   : > { %s1667_s14 = scalar_lea.vmem %s1899_s28, 4096  ;;  %p1675_p2 = scmp.lt.s32.totalorder %s1899_s28, %s1899_s28 }
  0x1d   : > { %p1668_p9 = scmp.ne.s32.totalorder %s1899_s28, %s1667_s14  ;;  %p1676_p12 = scmp.lt.s32.totalorder %s1667_s14, %s1667_s14 }
  0x1f   : > { %p1670_p10 = pnand %p1668_p9, %p1656_p13  ;;  %p1677_p0 = por %p1676_p12, %p1675_p2 }
  0x21   : > { %p1671_p1 = pneg %p1670_p10 }
  0x23   : > { %p1678_p6 = pnand %p1677_p0, %p1671_p1 }
  0x25   : > { %1681 = shalt.err (!%p1678_p6)
}
  0x26   : > { %s1814_s15 = smov 256   ;;  %s1815_s16 = smov 16  }
  0x27   : > { %1481 = dma.hbm_to_vmem [thread:$0]  (!%p1906_p11), %s2287_s1, 4096, %s1899_s28, [#allocation6], %s1814_s15, %s1814_s15, %s1815_s16  }
  0x28   : > { %s1682_s7 = scalar_lea.hbm %s2289_s3, 4096 }
  0x29   : > { %p1683_p2 = scmp.ne.s32.totalorder %s2289_s3, %s1682_s7  ;;  %p1689_p10 = scmp.lt.u32.totalorder %s1682_s7, %s2289_s3 }
  0x2b   : > { %p1685_p1 = pnand %p1683_p2, %p1656_p13 }
  0x2d   : > { %p1686_p6 = pneg %p1685_p1 }
  0x2f   : > { %p1691_p3 = pnand %p1689_p10, %p1686_p6 }
  0x31   : > { %1694 = shalt.err (!%p1691_p3)
}
  0x32   : > { %s1695_s28 = scalar_lea.vmem %s1910_s6, 4096  ;;  %p1703_p12 = scmp.lt.s32.totalorder %s1910_s6, %s1910_s6 }
  0x33   : > { %p1696_p5 = scmp.ne.s32.totalorder %s1910_s6, %s1695_s28  ;;  %p1704_p0 = scmp.lt.s32.totalorder %s1695_s28, %s1695_s28 }
  0x35   : > { %p1698_p7 = pnand %p1696_p5, %p1656_p13  ;;  %p1705_p2 = por %p1704_p0, %p1703_p12 }
  0x37   : > { %p1699_p9 = pneg %p1698_p7 }
  0x39   : > { %p1706_p1 = pnand %p1705_p2, %p1699_p9 }
  0x3b   : > { %1709 = shalt.err (!%p1706_p1)
}
  0x3c   : > { %s1816_s12 = smov 64   ;;  %s1817_s13 = smov 4  }
  0x3d   : > { %1484 = dma.hbm_to_vmem [thread:$0]  (!%p1906_p11), %s2289_s3, 4096, %s1910_s6, [#allocation6], %s1816_s12, %s1816_s12, %s1817_s13  }
  0x3e   : > { %s1965_s16 = sadd.s32 1, %s1810_s21   ;;  %s29_s23 = sadd.s32 1, %s1806_s20 }
  0x3f   : > { %s26_s17 = ssub.s32 %s1810_s21, %s1965_s16  ;;  %p36_p6 = scmp.ne.s32.totalorder %s1806_s20, %s1802_s19 }
  0x40   : > { %p27_p13 = scmp.eq.s32.totalorder %s26_s17, 0  ;;  %p37_p10 = scmp.eq.s32.totalorder %s1810_s21, 0 }
  0x41   : > { %p2299_p5 = scmp.eq.s32.totalorder %s1876_s22, 1  ;;  %p1495_p9 = scmp.lt.s32.totalorder %s1810_s21, 2 }
  0x42   : > { %s1974_s27 = scalar_select %p27_p13, %s1806_s20, %s29_s23  }
  0x43   : > { %p38_p3 = por %p37_p10, %p36_p6  ;;  %p1978_p7 = por %p2299_p5, %p36_p6 }
  0x44   : > { %s208_s29 = sand.u32 1, %s1806_s20   ;;  %s1384_s6 = sshll.u32 %s1810_s21, 10 }
  0x45   : > { %s2300_s30 = scalar_select %p1978_p7, 1, 0 }
  0x46   : > { %s1306_s7 = sshll.u32 %s208_s29, 6  ;;  %s1988_s10 = scalar_lea.hbm %s2286_s0, %s1384_s6 }
  0x47   : > { %s212_s11 = scalar_lea.vmem [#allocation2], %s1306_s7  ;;  %p1992_p11 = pnand %p1495_p9, %p38_p3 }
  0x48   : > { %s219_s28 = sshll.u32 %s212_s11, 4  ;;  %s1996_s13 = scalar_lea.sflag [#allocation3], %s208_s29  ;;  %s1990_s28 = int_to_ptr.vmem [resolvable:$true] %s219_s28 }
  0x49   : > { %s1710_s14 = scalar_lea.hbm %s1988_s10, 1024  ;;  %p1712_p0 = pneg %p1992_p11 }
  0x4a   : > { %p1711_p12 = scmp.ne.s32.totalorder %s1988_s10, %s1710_s14  ;;  %s1715_s23 = scalar_lea.hbm %s2286_s0, 2048 }
  0x4b   : > { %p1716_p13 = scmp.lt.u32.totalorder %s1988_s10, %s2286_s0  ;;  %p1717_p6 = scmp.lt.u32.totalorder %s1715_s23, %s1710_s14 }
  0x4c   : > { %p1713_p2 = pnand %p1712_p0, %p1711_p12  ;;  %p1719_p3 = scmp.lt.u32.totalorder %s1710_s14, %s1988_s10 }
  0x4d   : > { %p1718_p10 = por %p1717_p6, %p1716_p13 }
  0x4e   : > { %p1714_p1 = pneg %p1713_p2 }
  0x4f   : > { %p1720_p5 = por %p1719_p3, %p1718_p10 }
  0x51   : > { %p1721_p9 = pnand %p1720_p5, %p1714_p1 }
  0x53   : > { %1724 = shalt.err (!%p1721_p9)
}
  0x54   : > { %s1725_s29 = scalar_lea.vmem %s1990_s28, 1024  ;;  %s1818_s8 = smov [#allocation2]  }
  0x55   : > { %p1726_p12 = scmp.ne.s32.totalorder %s1990_s28, %s1725_s29  ;;  %s1730_s9 = sshll.u32 %s1818_s8, 4  ;;  %s1731_s9 = int_to_ptr.vmem [resolvable:$false] %s1730_s9 }
  0x56   : > { %s1732_s11 = scalar_lea.vmem %s1731_s9, 2048  ;;  %p1733_p4 = scmp.lt.s32.totalorder %s1990_s28, %s1731_s9 }
  0x57   : > { %p1728_p2 = pnand %p1726_p12, %p1712_p0  ;;  %p1734_p13 = scmp.lt.s32.totalorder %s1732_s11, %s1725_s29 }
  0x59   : > { %p1729_p7 = pneg %p1728_p2  ;;  %p1735_p6 = por %p1734_p13, %p1733_p4 }
  0x5b   : > { %p1736_p10 = pnand %p1735_p6, %p1729_p7 }
  0x5d   : > { %1739 = shalt.err (!%p1736_p10)
}
  0x5e   : > { %s1819_s14 = smov 128   ;;  %s1820_s15 = smov 8  }
  0x5f   : > { %1488 = dma.hbm_to_vmem [thread:$0]  (!%p1992_p11), %s1988_s10, 1024, %s1990_s28, %s1996_s13, %s1819_s14, %s1819_s14, %s1820_s15  }
  0x60   : > { %231 = sbr.rel (%p1895_p8) target bundleno = 649 (0x289), region = 40  ;;  %s2027_s17 = sand.u32 (!%p1895_p8), 1, %s1802_s19  }
  0x61   : > { %s1310_s23 = sshll.u32 (!%p1895_p8), %s2027_s17, 6  ;;  %s234_s7 = scalar_lea.sflag (!%p1895_p8), [#allocation3], %s2027_s17 }
  0x62   : > { %s2033_s6 = scalar_lea.vmem (!%p1895_p8), [#allocation2], %s1310_s23  ;;  %p2302_p4 = scmp.ne.s32.totalorder (!%p1895_p8), %s2295_s24, 0 }
  0x67   : > { %1785 = dma.done.wait (%p2302_p4), %s234_s7, 1024  }
  0x68   : > { %1787 = vsyncadd (%p2302_p4), %s234_s7, 4294966272  ;;  %p2303_p7 = scmp.eq.s32.totalorder %s1876_s22, 0 }
  0x6a   : > { %1789 = dma.done.wait (%p2303_p7), [#allocation6], 8192   ;;  %p2304_p8 = pmov %p2303_p7 }
  0x6b   : > { %v1821_v0 = vmov 0   ;;  %v1542_v1 = vld [vmem:[#allocation5 + $0x4] ss:$16 sps:$4 sm:$0xff]   ;;  %v1544_v2 = vld [vmem:[#allocation5 + $0xc] ss:$16 sps:$4 sm:$0xff]   ;;  %s2219_s12 = scalar_lea.vmem [#allocation8], %s1310_s23 }
  0x6c   : > { %1791 = vsyncadd (%p2304_p8), [#allocation6], 4294959104  ;;  %536 = vmatprep.mubr.bf16.mxu0 %v1821_v0  ;;  %609 = vmatprep.mubr.bf16.mxu1 %v1821_v0  ;;  %v1546_v3 = vld [vmem:[#allocation5] ss:$16 sps:$4 sm:$0xff]   ;;  %v1547_v4 = vld [vmem:[#allocation5 + $0x8] ss:$16 sps:$4 sm:$0xff]  }
  0x6d   : > { %504 = vmatprep.subr.bf16.mxu0 %v1542_v1  ;;  %577 = vmatprep.subr.bf16.mxu1 %v1544_v2  ;;  %v1548_v5 = vld [vmem:[#allocation5 + $0x24] ss:$16 sps:$4 sm:$0xff]   ;;  %v1550_v6 = vld [vmem:[#allocation5 + $0x2c] ss:$16 sps:$4 sm:$0xff]   ;;  %v1552_v7 = vld [vmem:[#allocation5 + $0x20] ss:$16 sps:$4 sm:$0xff]  }
  0x6e   : > { %505 = vmatpush1.bf16.msra.mxu0 %v1546_v3  ;;  %578 = vmatpush1.bf16.msra.mxu1 %v1547_v4  ;;  %v1553_v8 = vld [vmem:[#allocation5 + $0x28] ss:$16 sps:$4 sm:$0xff]   ;;  %v1554_v9 = vld [vmem:[#allocation5 + $0x44] ss:$16 sps:$4 sm:$0xff]   ;;  %v1556_v10 = vld [vmem:[#allocation5 + $0x4c] ss:$16 sps:$4 sm:$0xff]  }
  0x6f   : > { %506 = vmatprep.subr.bf16.mxu0 %v1548_v5  ;;  %579 = vmatprep.subr.bf16.mxu1 %v1550_v6  ;;  %v1558_v11 = vld [vmem:[#allocation5 + $0x40] ss:$16 sps:$4 sm:$0xff]   ;;  %v1559_v12 = vld [vmem:[#allocation5 + $0x48] ss:$16 sps:$4 sm:$0xff]   ;;  %v1560_v13 = vld [vmem:[#allocation5 + $0x64] ss:$16 sps:$4 sm:$0xff]  }
  0x70   : > { %v1562_v14 = vld [vmem:[#allocation5 + $0x6c] ss:$16 sps:$4 sm:$0xff]   ;;  %v1564_v15 = vld [vmem:[#allocation5 + $0x60] ss:$16 sps:$4 sm:$0xff]   ;;  %v1565_v16 = vld [vmem:[#allocation5 + $0x68] ss:$16 sps:$4 sm:$0xff]  }
  0x71   : > { %v1566_v17 = vld [vmem:[#allocation5 + $0x84] ss:$16 sps:$4 sm:$0xff]   ;;  %v1568_v18 = vld [vmem:[#allocation5 + $0x8c] ss:$16 sps:$4 sm:$0xff]   ;;  %v1570_v19 = vld [vmem:[#allocation5 + $0x80] ss:$16 sps:$4 sm:$0xff]  }
  0x72   : > { %507 = vmatpush1.bf16.msra.mxu0 %v1552_v7  ;;  %580 = vmatpush1.bf16.msra.mxu1 %v1553_v8  ;;  %v1571_v20 = vld [vmem:[#allocation5 + $0x88] ss:$16 sps:$4 sm:$0xff]   ;;  %v1572_v21 = vld [vmem:[#allocation5 + $0xa4] ss:$16 sps:$4 sm:$0xff]   ;;  %v1574_v22 = vld [vmem:[#allocation5 + $0xac] ss:$16 sps:$4 sm:$0xff]  }
  0x73   : > { %508 = vmatprep.subr.bf16.mxu0 %v1554_v9  ;;  %581 = vmatprep.subr.bf16.mxu1 %v1556_v10  ;;  %v1576_v23 = vld [vmem:[#allocation5 + $0xa0] ss:$16 sps:$4 sm:$0xff]   ;;  %v1577_v24 = vld [vmem:[#allocation5 + $0xa8] ss:$16 sps:$4 sm:$0xff]   ;;  %v1578_v25 = vld [vmem:[#allocation5 + $0xc4] ss:$16 sps:$4 sm:$0xff]  }
  0x74   : > { %v1580_v26 = vld [vmem:[#allocation5 + $0xcc] ss:$16 sps:$4 sm:$0xff]   ;;  %v1582_v27 = vld [vmem:[#allocation5 + $0xc0] ss:$16 sps:$4 sm:$0xff]   ;;  %v1583_v28 = vld [vmem:[#allocation5 + $0xc8] ss:$16 sps:$4 sm:$0xff]  }
  0x75   : > { %v1584_v29 = vld [vmem:[#allocation5 + $0xe4] ss:$16 sps:$4 sm:$0xff]   ;;  %v1586_v30 = vld [vmem:[#allocation5 + $0xec] ss:$16 sps:$4 sm:$0xff]   ;;  %v1588_v31 = vld [vmem:[#allocation5 + $0xe0] ss:$16 sps:$4 sm:$0xff]  }
  0x76   : > { %509 = vmatpush1.bf16.msra.mxu0 %v1558_v11  ;;  %582 = vmatpush1.bf16.msra.mxu1 %v1559_v12  ;;  %v1589_v32 = vld [vmem:[#allocation5 + $0xe8] ss:$16 sps:$4 sm:$0xff]   ;;  %v278_v33 = vld [vmem:[%s2033_s6] sm:$0xff]  ;;  %v280_v36 = vld [vmem:[%s2033_s6 + $0x10] sm:$0xff]  ;;  %s1209_s13 = sshll.u32 %s2219_s12, 4  ;;  %s1385_s29 = sshll.u32 %s1876_s22, 10  ;;  %s2234_s13 = int_to_ptr.vmem [resolvable:$true] %s1209_s13 }
  0x77   : > { %510 = vmatprep.subr.bf16.mxu0 %v1560_v13  ;;  %583 = vmatprep.subr.bf16.mxu1 %v1562_v14  ;;  %v279_v34 = vld [vmem:[%s2033_s6 + $0x8] sm:$0xff]  ;;  %v281_v37 = vld [vmem:[%s2033_s6 + $0x18] sm:$0xff]  ;;  %v282_v39 = vld [vmem:[%s2033_s6 + $0x20] sm:$0xff]  ;;  %v324_v13 = vlaneseq  ;;  %s2240_s11 = scalar_lea.hbm %s2291_s5, %s1385_s29  ;;  %s1196_s14 = scalar_lea.sflag [#allocation4], %s2027_s17 }
  0x78   : > { %v286_v35 = vpack.c.bf16 %v279_v34, %v278_v33  ;;  %v287_v38 = vpack.c.bf16 %v281_v37, %v280_v36  ;;  %v283_v40 = vld [vmem:[%s2033_s6 + $0x28] sm:$0xff]  ;;  %v284_v42 = vld [vmem:[%s2033_s6 + $0x30] sm:$0xff]  ;;  %v285_v43 = vld [vmem:[%s2033_s6 + $0x38] sm:$0xff]  ;;  %s1740_s15 = scalar_lea.vmem %s2234_s13, 1024  ;;  %p2305_p0 = scmp.ne.s32.totalorder %s2300_s30, 0 }
  0x79   : > { %v288_v41 = vpack.c.bf16 %v283_v40, %v282_v39  ;;  %v289_v44 = vpack.c.bf16 %v285_v43, %v284_v42  ;;  %v1590_v45 = vld [vmem:[#allocation7 + $0x40] sm:$0xff]   ;;  %v1594_v49 = vld [vmem:[#allocation7 + $0x48] sm:$0xff]   ;;  %v1598_v53 = vld [vmem:[#allocation7 + $0x50] sm:$0xff]   ;;  %v325_v14 = vshrl.u32 %v324_v13, 7  ;;  %p1741_p11 = scmp.ne.s32.totalorder %s2234_s13, %s1740_s15  ;;  %s1822_s22 = smov [#allocation8]  }
  0x7a   : > { %511 = vmatpush1.bf16.msra.mxu0 %v1564_v15  ;;  %584 = vmatpush1.bf16.msra.mxu1 %v1565_v16  ;;  %v1592_v46 = vld [vmem:[#allocation7 + $0xc0] sm:$0xff]   ;;  %v1596_v50 = vld [vmem:[#allocation7 + $0xc8] sm:$0xff]   ;;  %v1600_v54 = vld [vmem:[#allocation7 + $0xd0] sm:$0xff]   ;;  %s1744_s23 = sshll.u32 %s1822_s22, 4  ;;  %s1745_s23 = int_to_ptr.vmem [resolvable:$false] %s1744_s23 }
  0x7b   : > { %512 = vmatprep.subr.bf16.mxu0 %v1566_v17  ;;  %585 = vmatprep.subr.bf16.mxu1 %v1568_v18  ;;  %v1591_v47 = vld [vmem:[#allocation7] sm:$0xff]   ;;  %v1595_v51 = vld [vmem:[#allocation7 + $0x8] sm:$0xff]   ;;  %v1599_v55 = vld [vmem:[#allocation7 + $0x10] sm:$0xff]   ;;  %v334_v15 = vsub.s32 2, %v325_v14  ;;  %v338_v16 = vsub.s32 3, %v325_v14  ;;  %v326_v17 = vsub.s32 0, %v325_v14  ;;  %p1742_p1 = pnand %p1741_p11, %p2305_p0  ;;  %p1747_p5 = scmp.lt.s32.totalorder %s2234_s13, %s1745_s23 }
  0x7c   : > { %v1593_v48 = vld [vmem:[#allocation7 + $0x80] sm:$0xff]   ;;  %v1597_v52 = vld [vmem:[#allocation7 + $0x88] sm:$0xff]   ;;  %v1601_v56 = vld [vmem:[#allocation7 + $0x90] sm:$0xff]   ;;  %s1746_s7 = scalar_lea.vmem %s1745_s23, 2048 }
  0x7d   : > { %v1602_v57 = vld [vmem:[#allocation7 + $0x58] sm:$0xff]   ;;  %v1606_v61 = vld [vmem:[#allocation7 + $0x60] sm:$0xff]   ;;  %v1610_v1 = vld [vmem:[#allocation7 + $0x68] sm:$0xff]   ;;  %p1743_p3 = pneg %p1742_p1  ;;  %p1748_p9 = scmp.lt.s32.totalorder %s1746_s7, %s1740_s15 }
  0x7e   : > { %513 = vmatpush1.bf16.msra.mxu0 %v1570_v19  ;;  %586 = vmatpush1.bf16.msra.mxu1 %v1571_v20  ;;  %v1604_v58 = vld [vmem:[#allocation7 + $0xd8] sm:$0xff]   ;;  %v1608_v62 = vld [vmem:[#allocation7 + $0xe0] sm:$0xff]   ;;  %v1612_v2 = vld [vmem:[#allocation7 + $0xe8] sm:$0xff]   ;;  %v330_v19 = vsub.s32 1, %v325_v14 }
  0x7f   : > { %514 = vmatprep.subr.bf16.mxu0 %v1572_v21  ;;  %587 = vmatprep.subr.bf16.mxu1 %v1574_v22  ;;  %v1603_v59 = vld [vmem:[#allocation7 + $0x18] sm:$0xff]   ;;  %v1607_v63 = vld [vmem:[#allocation7 + $0x20] sm:$0xff]   ;;  %v1611_v3 = vld [vmem:[#allocation7 + $0x28] sm:$0xff]   ;;  %p1749_p12 = por %p1748_p9, %p1747_p5 }
  0x80   : > { %v1605_v60 = vld [vmem:[#allocation7 + $0x98] sm:$0xff]   ;;  %v1613_v4 = vld [vmem:[#allocation7 + $0xa8] sm:$0xff]   ;;  %v1614_v5 = vld [vmem:[#allocation7 + $0x70] sm:$0xff]  }
  0x81   : > { %v1616_v6 = vld [vmem:[#allocation7 + $0xf0] sm:$0xff]   ;;  %v1618_v9 = vld [vmem:[#allocation7 + $0x78] sm:$0xff]   ;;  %v322_v18 = vld [vmem:[%s2288_s2] sm:$0xf]  ;;  %p1750_p2 = pnand %p1749_p12, %p1743_p3 }
  0x82   : > { %515 = vmatpush1.bf16.msra.mxu0 %v1576_v23  ;;  %588 = vmatpush1.bf16.msra.mxu1 %v1577_v24  ;;  %v1615_v7 = vld [vmem:[#allocation7 + $0x30] sm:$0xff]   ;;  %v1620_v10 = vld [vmem:[#allocation7 + $0xf8] sm:$0xff]   ;;  %v2062_v20 = vrot.slane %v322_v18, %v334_v15  ;;  %v2064_v21 = vrot.slane %v322_v18, %v338_v16  ;;  %v2066_v22 = vrot.slane %v322_v18, %v326_v17 }
  0x83   : > { %516 = vmatprep.subr.bf16.mxu0 %v1578_v25  ;;  %589 = vmatprep.subr.bf16.mxu1 %v1580_v26  ;;  %v1617_v8 = vld [vmem:[#allocation7 + $0xb0] sm:$0xff]   ;;  %v1619_v11 = vld [vmem:[#allocation7 + $0x38] sm:$0xff]   ;;  %v2068_v25 = vrot.slane %v322_v18, %v330_v19 }
  0x84   : > { %v1621_v12 = vld [vmem:[#allocation7 + $0xb8] sm:$0xff]  }
  0x86   : > { %517 = vmatpush1.bf16.msra.mxu0 %v1582_v27  ;;  %590 = vmatpush1.bf16.msra.mxu1 %v1583_v28 }
  0x87   : > { %518 = vmatprep.subr.bf16.mxu0 %v1584_v29  ;;  %591 = vmatprep.subr.bf16.mxu1 %v1586_v30 }
  0x8a   : > { %519 = vmatpush1.bf16.msra.mxu0 %v1588_v31  ;;  %592 = vmatpush1.bf16.msra.mxu1 %v1589_v32 }
  0x8b   : > { %1386 = vmatprep.subr.bf16.mxu0 %v1590_v45  ;;  %1426 = vmatprep.subr.bf16.mxu1 %v1592_v46 }
  0x8d   : > { %537 = vmatmul.mubr.bf16.vlgmr.msra.gmra.mrb[0].mxu0 %v286_v35  ;;  %610 = vmatmul.mubr.bf16.vlgmr.msra.gmra.mrb[0].mxu1 %v286_v35 }
  0x8e   : > { %546 = vmatprep.mubr.bf16.mxu0 %v1821_v0  ;;  %619 = vmatprep.mubr.bf16.mxu1 %v1821_v0 }
  0x8f   : > { %1387 = vmatpush3.bf16.msra.mxu0 %v1591_v47  ;;  %1427 = vmatpush3.bf16.msra.mxu1 %v1593_v48 }
  0x90   : > { %1388 = vmatprep.subr.bf16.mxu0 %v1594_v49  ;;  %1428 = vmatprep.subr.bf16.mxu1 %v1596_v50 }
  0x93   : > { %1389 = vmatpush3.bf16.msra.mxu0 %v1595_v51  ;;  %1429 = vmatpush3.bf16.msra.mxu1 %v1597_v52 }
  0x94   : > { %1390 = vmatprep.subr.bf16.mxu0 %v1598_v53  ;;  %1430 = vmatprep.subr.bf16.mxu1 %v1600_v54 }
  0x95   : > { %547 = vmatmul.mubr.bf16.gmra.mrb[4].mxu0 %v287_v38  ;;  %620 = vmatmul.mubr.bf16.gmra.mrb[4].mxu1 %v287_v38 }
  0x96   : > { %556 = vmatprep.mubr.bf16.mxu0 %v1821_v0  ;;  %629 = vmatprep.mubr.bf16.mxu1 %v1821_v0 }
  0x97   : > { %1391 = vmatpush3.bf16.msra.mxu0 %v1599_v55  ;;  %1431 = vmatpush3.bf16.msra.mxu1 %v1601_v56 }
  0x98   : > { %1392 = vmatprep.subr.bf16.mxu0 %v1602_v57  ;;  %1432 = vmatprep.subr.bf16.mxu1 %v1604_v58 }
  0x9b   : > { %1393 = vmatpush3.bf16.msra.mxu0 %v1603_v59  ;;  %1433 = vmatpush3.bf16.msra.mxu1 %v1605_v60 }
  0x9c   : > { %1394 = vmatprep.subr.bf16.mxu0 %v1606_v61  ;;  %1434 = vmatprep.subr.bf16.mxu1 %v1608_v62 }
  0x9d   : > { %557 = vmatmul.mubr.bf16.gmra.mrb[8].mxu0 %v288_v41  ;;  %630 = vmatmul.mubr.bf16.gmra.mrb[8].mxu1 %v288_v41 }
  0x9e   : > { %566 = vmatprep.mubr.bf16.mxu0 %v1821_v0  ;;  %639 = vmatprep.mubr.bf16.mxu1 %v1821_v0  ;;  %v1609_v0 = vld [vmem:[#allocation7 + $0xa0] sm:$0xff]  }
  0x9f   : > { %1395 = vmatpush3.bf16.msra.mxu0 %v1607_v63  ;;  %1435 = vmatpush3.bf16.msra.mxu1 %v1609_v0 }
  0xa0   : > { %1396 = vmatprep.subr.bf16.mxu0 %v1610_v1  ;;  %1436 = vmatprep.subr.bf16.mxu1 %v1612_v2 }
  0xa3   : > { %1397 = vmatpush3.bf16.msra.mxu0 %v1611_v3  ;;  %1437 = vmatpush3.bf16.msra.mxu1 %v1613_v4 }
  0xa4   : > { %1398 = vmatprep.subr.bf16.mxu0 %v1614_v5  ;;  %1438 = vmatprep.subr.bf16.mxu1 %v1616_v6 }
  0xa5   : > { %567 = vmatmul.mubr.bf16.gmra.mrb[12].mxu0 %v289_v44  ;;  %640 = vmatmul.mubr.bf16.gmra.mrb[12].mxu1 %v289_v44 }
  0xa7   : > { %1399 = vmatpush3.bf16.msra.mxu0 %v1615_v7  ;;  %1439 = vmatpush3.bf16.msra.mxu1 %v1617_v8 }
  0xa8   : > { %1400 = vmatprep.subr.bf16.mxu0 %v1618_v9  ;;  %1440 = vmatprep.subr.bf16.mxu1 %v1620_v10 }
  0xab   : > { %1401 = vmatpush3.bf16.msra.mxu0 %v1619_v11  ;;  %1441 = vmatpush3.bf16.msra.mxu1 %v1621_v12 }
 0x160   : > { %v538_v23 = vpop.f32.mrb[0].mxu0  ;;  %v611_v24 = vpop.f32.mrb[0].mxu1 }
 0x161   : > { %v612_v26 = vadd.f32 %v611_v24, %v2062_v20  ;;  %v540_v27 = vpop.f32.mrb[1].mxu0  ;;  %v613_v28 = vpop.f32.mrb[1].mxu1  ;;  %v539_v32 = vadd.f32 %v538_v23, %v2066_v22 }
 0x162   : > { %v614_v29 = vadd.f32 %v613_v28, %v2064_v21  ;;  %v542_v30 = vpop.f32.mrb[2].mxu0  ;;  %v615_v31 = vpop.f32.mrb[2].mxu1  ;;  %v541_v37 = vadd.f32 %v540_v27, %v2068_v25 }
 0x163   : > { %v543_v33 = vadd.f32 %v542_v30, %v2066_v22  ;;  %v616_v34 = vadd.f32 %v615_v31, %v2062_v20  ;;  %v544_v35 = vpop.f32.mrb[3].mxu0  ;;  %v617_v36 = vpop.f32.mrb[3].mxu1 }
 0x164   : > { %v545_v38 = vadd.f32 %v544_v35, %v2068_v25  ;;  %v618_v39 = vadd.f32 %v617_v36, %v2064_v21 }
 0x165   : > { %v2078_v40 = vpack.c.bf16 %v543_v33, %v539_v32  ;;  %v2080_v41 = vpack.c.bf16 %v616_v34, %v612_v26 }
 0x166   : > { %v2082_v42 = vpack.c.bf16 %v545_v38, %v541_v37  ;;  %v2084_v43 = vpack.c.bf16 %v618_v39, %v614_v29 }
 0x167   : > { %v666_v44 = vmul.bf16 %v2078_v40, %v2078_v40  ;;  %v668_v45 = vmul.bf16 %v2080_v41, %v2080_v41  ;;  %v730_v16 = vmul.bf16 1056980736, %v2078_v40  ;;  %v732_v19 = vmul.bf16 1056980736, %v2080_v41 }
 0x168   : > { %v667_v46 = vmul.bf16 %v2082_v42, %v2082_v42  ;;  %v669_v47 = vmul.bf16 %v2084_v43, %v2084_v43  ;;  %v548_v48 = vpop.f32.mrb[4].mxu0  ;;  %v621_v49 = vpop.f32.mrb[4].mxu1 }
 0x169   : > { %v682_v50 = vmul.bf16 1024605458, %v666_v44  ;;  %v684_v51 = vmul.bf16 1024605458, %v668_v45  ;;  %v549_v52 = vadd.f32 %v548_v48, %v2066_v22  ;;  %v622_v53 = vadd.f32 %v621_v49, %v2062_v20  ;;  %v550_v54 = vpop.f32.mrb[5].mxu0  ;;  %v623_v55 = vpop.f32.mrb[5].mxu1 }
 0x16a   : > { %v683_v56 = vmul.bf16 1024605458, %v667_v46  ;;  %v685_v57 = vmul.bf16 1024605458, %v669_v47  ;;  %v551_v58 = vadd.f32 %v550_v54, %v2068_v25  ;;  %v624_v59 = vadd.f32 %v623_v55, %v2064_v21  ;;  %v552_v60 = vpop.f32.mrb[6].mxu0  ;;  %v625_v61 = vpop.f32.mrb[6].mxu1 }
 0x16b   : > { %v698_v62 = vadd.bf16 1061961548, %v682_v50  ;;  %v700_v63 = vadd.bf16 1061961548, %v684_v51  ;;  %v553_v0 = vadd.f32 %v552_v60, %v2066_v22  ;;  %v626_v1 = vadd.f32 %v625_v61, %v2062_v20  ;;  %v554_v2 = vpop.f32.mrb[7].mxu0  ;;  %v627_v3 = vpop.f32.mrb[7].mxu1 }
 0x16c   : > { %v699_v4 = vadd.bf16 1061961548, %v683_v56  ;;  %v701_v5 = vadd.bf16 1061961548, %v685_v57  ;;  %v555_v6 = vadd.f32 %v554_v2, %v2068_v25  ;;  %v628_v7 = vadd.f32 %v627_v3, %v2064_v21 }
 0x16d   : > { %v714_v8 = vmul.bf16 %v698_v62, %v2078_v40  ;;  %v716_v9 = vmul.bf16 %v700_v63, %v2080_v41  ;;  %v2104_v10 = vpack.c.bf16 %v553_v0, %v549_v52  ;;  %v2106_v11 = vpack.c.bf16 %v626_v1, %v622_v53 }
 0x16e   : > { %v715_v12 = vmul.bf16 %v699_v4, %v2082_v42  ;;  %v717_v13 = vmul.bf16 %v701_v5, %v2084_v43  ;;  %v2110_v14 = vpack.c.bf16 %v555_v6, %v551_v58  ;;  %v2112_v15 = vpack.c.bf16 %v628_v7, %v624_v59 }
 0x16f   : > { %1622 = vtanh.bf16 %v714_v8  ;;  %v670_v17 = vmul.bf16 %v2104_v10, %v2104_v10  ;;  %v672_v18 = vmul.bf16 %v2106_v11, %v2106_v11  ;;  %v731_v62 = vmul.bf16 1056980736, %v2082_v42 }
 0x170   : > { %1624 = vtanh.bf16 %v716_v9  ;;  %v671_v23 = vmul.bf16 %v2110_v14, %v2110_v14  ;;  %v673_v24 = vmul.bf16 %v2112_v15, %v2112_v15  ;;  %v558_v26 = vpop.f32.mrb[8].mxu0  ;;  %v631_v27 = vpop.f32.mrb[8].mxu1  ;;  %v733_v3 = vmul.bf16 1056980736, %v2084_v43 }
 0x171   : > { %1626 = vtanh.bf16 %v715_v12  ;;  %v686_v28 = vmul.bf16 1024605458, %v670_v17  ;;  %v688_v29 = vmul.bf16 1024605458, %v672_v18  ;;  %v559_v30 = vadd.f32 %v558_v26, %v2066_v22  ;;  %v560_v31 = vpop.f32.mrb[9].mxu0  ;;  %v633_v32 = vpop.f32.mrb[9].mxu1 }
 0x172   : > { %1628 = vtanh.bf16 %v717_v13  ;;  %v687_v33 = vmul.bf16 1024605458, %v671_v23  ;;  %v689_v34 = vmul.bf16 1024605458, %v673_v24  ;;  %v632_v35 = vadd.f32 %v631_v27, %v2062_v20  ;;  %v562_v36 = vpop.f32.mrb[10].mxu0  ;;  %v635_v37 = vpop.f32.mrb[10].mxu1 }
 0x173   : > { %v702_v38 = vadd.bf16 1061961548, %v686_v28  ;;  %v704_v39 = vadd.bf16 1061961548, %v688_v29  ;;  %v561_v44 = vadd.f32 %v560_v31, %v2068_v25  ;;  %v634_v45 = vadd.f32 %v633_v32, %v2064_v21  ;;  %v564_v46 = vpop.f32.mrb[11].mxu0  ;;  %v637_v47 = vpop.f32.mrb[11].mxu1 }
 0x174   : > { %v703_v48 = vadd.bf16 1061961548, %v687_v33  ;;  %v705_v49 = vadd.bf16 1061961548, %v689_v34  ;;  %v563_v50 = vadd.f32 %v562_v36, %v2066_v22  ;;  %v636_v51 = vadd.f32 %v635_v37, %v2062_v20 }
 0x175   : > { %v718_v52 = vmul.bf16 %v702_v38, %v2104_v10  ;;  %v720_v53 = vmul.bf16 %v704_v39, %v2106_v11  ;;  %v565_v54 = vadd.f32 %v564_v46, %v2068_v25  ;;  %v638_v55 = vadd.f32 %v637_v47, %v2064_v21 }
 0x176   : > { %v719_v56 = vmul.bf16 %v703_v48, %v2110_v14  ;;  %v721_v57 = vmul.bf16 %v705_v49, %v2112_v15  ;;  %v2136_v58 = vpack.c.bf16 %v563_v50, %v559_v30  ;;  %v2138_v59 = vpack.c.bf16 %v636_v51, %v632_v35 }
 0x177   : > { %1630 = vtanh.bf16 %v718_v52  ;;  %v2140_v60 = vpack.c.bf16 %v565_v54, %v561_v44  ;;  %v2142_v61 = vpack.c.bf16 %v638_v55, %v634_v45  ;;  %v735_v7 = vmul.bf16 1056980736, %v2110_v14 }
 0x178   : > { %1632 = vtanh.bf16 %v720_v53  ;;  %v674_v63 = vmul.bf16 %v2136_v58, %v2136_v58  ;;  %v676_v0 = vmul.bf16 %v2138_v59, %v2138_v59  ;;  %v568_v1 = vpop.f32.mrb[12].mxu0  ;;  %v641_v2 = vpop.f32.mrb[12].mxu1 }
 0x179   : > { %1634 = vtanh.bf16 %v719_v56  ;;  %v675_v4 = vmul.bf16 %v2140_v60, %v2140_v60  ;;  %v677_v5 = vmul.bf16 %v2142_v61, %v2142_v61  ;;  %v570_v6 = vpop.f32.mrb[13].mxu0  ;;  %v643_v42 = vpop.f32.mrb[13].mxu1  ;;  %v569_v13 = vadd.f32 %v568_v1, %v2066_v22 }
 0x17a   : > { %v1623_v8 = vpop.eup %1622  ;;  %1636 = vtanh.bf16 %v721_v57  ;;  %v690_v9 = vmul.bf16 1024605458, %v674_v63  ;;  %v692_v12 = vmul.bf16 1024605458, %v676_v0  ;;  %v572_v17 = vpop.f32.mrb[14].mxu0  ;;  %v642_v27 = vadd.f32 %v641_v2, %v2062_v20 }
 0x17b   : > { %v645_v18 = vpop.f32.mrb[14].mxu1  ;;  %v1625_v43 = vpop.eup %1624  ;;  %v762_v23 = vmul.bf16 %v1623_v8, %v730_v16  ;;  %v691_v24 = vmul.bf16 1024605458, %v675_v4  ;;  %v693_v26 = vmul.bf16 1024605458, %v677_v5  ;;  %v571_v34 = vadd.f32 %v570_v6, %v2068_v25 }
 0x17c   : > { %v574_v28 = vpop.f32.mrb[15].mxu0  ;;  %v647_v29 = vpop.f32.mrb[15].mxu1  ;;  %v764_v31 = vmul.bf16 %v1625_v43, %v732_v19  ;;  %v706_v32 = vadd.bf16 1061961548, %v690_v9  ;;  %v708_v33 = vadd.bf16 1061961548, %v692_v12  ;;  %v644_v38 = vadd.f32 %v643_v42, %v2064_v21 }
 0x17d   : > { %v1627_v30 = vpop.eup %1626  ;;  %v707_v36 = vadd.bf16 1061961548, %v691_v24  ;;  %v709_v37 = vadd.bf16 1061961548, %v693_v26  ;;  %v573_v39 = vadd.f32 %v572_v17, %v2066_v22  ;;  %v778_v44 = vadd.bf16 %v762_v23, %v730_v16 }
 0x17e   : > { %v1629_v35 = vpop.eup %1628  ;;  %v722_v45 = vmul.bf16 %v706_v32, %v2136_v58  ;;  %v724_v46 = vmul.bf16 %v708_v33, %v2138_v59  ;;  %v646_v47 = vadd.f32 %v645_v18, %v2062_v20  ;;  %v575_v51 = vadd.f32 %v574_v28, %v2068_v25 }
 0x17f   : > { %v723_v48 = vmul.bf16 %v707_v36, %v2140_v60  ;;  %v725_v49 = vmul.bf16 %v709_v37, %v2142_v61  ;;  %v2171_v50 = vpack.c.bf16 %v573_v39, %v569_v13  ;;  %v648_v22 = vadd.f32 %v647_v29, %v2064_v21 }
 0x180   : > { %1638 = vtanh.bf16 %v722_v45  ;;  %v2174_v52 = vpack.c.bf16 %v646_v47, %v642_v27  ;;  %v763_v40 = vmul.bf16 %v1627_v30, %v731_v62  ;;  %v2179_v53 = vpack.c.bf16 %v575_v51, %v571_v34 }
 0x181   : > { %1640 = vtanh.bf16 %v724_v46  ;;  %v678_v16 = vmul.bf16 %v2171_v50, %v2171_v50  ;;  %v765_v20 = vmul.bf16 %v1629_v35, %v733_v3  ;;  %v2183_v56 = vpack.c.bf16 %v648_v22, %v644_v38 }
 0x182   : > { %v1631_v54 = vpop.eup %1630  ;;  %1642 = vtanh.bf16 %v723_v48  ;;  %v680_v55 = vmul.bf16 %v2174_v52, %v2174_v52  ;;  %v779_v25 = vadd.bf16 %v763_v40, %v731_v62  ;;  %v679_v21 = vmul.bf16 %v2179_v53, %v2179_v53 }
 0x183   : > { %v1633_v57 = vpop.eup %1632  ;;  %1644 = vtanh.bf16 %v725_v49  ;;  %v694_v63 = vmul.bf16 1024605458, %v678_v16  ;;  %v781_v0 = vadd.bf16 %v765_v20, %v733_v3  ;;  %v780_v2 = vadd.bf16 %v764_v31, %v732_v19 }
 0x184   : > { %v1635_v1 = vpop.eup %1634  ;;  %v696_v4 = vmul.bf16 1024605458, %v680_v55  ;;  %v681_v5 = vmul.bf16 %v2183_v56, %v2183_v56  ;;  %1089 = vmatprep.mubr.bf16.mxu0 %v779_v25  ;;  %v737_v6 = vmul.bf16 1056980736, %v2112_v15  ;;  %v695_v8 = vmul.bf16 1024605458, %v679_v21 }
 0x185   : > { %v1637_v42 = vpop.eup %1636  ;;  %v710_v62 = vadd.bf16 1061961548, %v694_v63  ;;  %1154 = vmatprep.mubr.bf16.mxu1 %v781_v0  ;;  %1090 = vmatmul.mubr.bf16.vlgmr.msra.gmra.mrb[16].mxu0 %v778_v44  ;;  %v767_v9 = vmul.bf16 %v1635_v1, %v735_v7  ;;  %v734_v3 = vmul.bf16 1056980736, %v2104_v10  ;;  %v736_v13 = vmul.bf16 1056980736, %v2106_v11 }
 0x186   : > { %v712_v12 = vadd.bf16 1061961548, %v696_v4  ;;  %v697_v41 = vmul.bf16 1024605458, %v681_v5  ;;  %1155 = vmatmul.mubr.bf16.vlgmr.msra.gmra.mrb[16].mxu1 %v780_v2  ;;  %v769_v19 = vmul.bf16 %v1637_v42, %v737_v6  ;;  %v711_v18 = vadd.bf16 1061961548, %v695_v8 }
 0x187   : > { %v726_v17 = vmul.bf16 %v710_v62, %v2171_v50  ;;  %v783_v15 = vadd.bf16 %v767_v9, %v735_v7  ;;  %v766_v43 = vmul.bf16 %v1631_v54, %v734_v3  ;;  %v768_v27 = vmul.bf16 %v1633_v57, %v736_v13 }
 0x188   : > { %v728_v23 = vmul.bf16 %v712_v12, %v2174_v52  ;;  %v713_v24 = vadd.bf16 1061961548, %v697_v41  ;;  %v785_v26 = vadd.bf16 %v769_v19, %v737_v6  ;;  %v727_v10 = vmul.bf16 %v711_v18, %v2179_v53 }
 0x189   : > { %1646 = vtanh.bf16 %v726_v17  ;;  %1097 = vmatprep.mubr.bf16.mxu0 %v783_v15  ;;  %v782_v29 = vadd.bf16 %v766_v43, %v734_v3  ;;  %v784_v14 = vadd.bf16 %v768_v27, %v736_v13  ;;  %v739_v7 = vmul.bf16 1056980736, %v2140_v60 }
 0x18a   : > { %1648 = vtanh.bf16 %v728_v23  ;;  %v729_v28 = vmul.bf16 %v713_v24, %v2183_v56  ;;  %1162 = vmatprep.mubr.bf16.mxu1 %v785_v26  ;;  %v741_v32 = vmul.bf16 1056980736, %v2142_v61  ;;  %v738_v33 = vmul.bf16 1056980736, %v2136_v58 }
 0x18b   : > { %v1639_v11 = vpop.eup %1638  ;;  %1650 = vtanh.bf16 %v727_v10  ;;  %v740_v36 = vmul.bf16 1056980736, %v2138_v59  ;;  %v743_v61 = vmul.bf16 1056980736, %v2179_v53  ;;  %v742_v58 = vmul.bf16 1056980736, %v2171_v50 }
 0x18c   : > { %v1641_v30 = vpop.eup %1640  ;;  %1652 = vtanh.bf16 %v729_v28  ;;  %v770_v38 = vmul.bf16 %v1639_v11, %v738_v33  ;;  %v745_v59 = vmul.bf16 1056980736, %v2183_v56  ;;  %v744_v51 = vmul.bf16 1056980736, %v2174_v52  ;;  %v2213_v52 = vld [vmem:[%s2290_s4] ss:$0 sm:$0xff] }
 0x18d   : > { %v1643_v31 = vpop.eup %1642  ;;  %1098 = vmatmul.mubr.bf16.gmra.mrb[20].mxu0 %v782_v29  ;;  %v772_v44 = vmul.bf16 %v1641_v30, %v740_v36 }
 0x18e   : > { %v1645_v34 = vpop.eup %1644  ;;  %1163 = vmatmul.mubr.bf16.gmra.mrb[20].mxu1 %v784_v14  ;;  %v771_v35 = vmul.bf16 %v1643_v31, %v739_v7  ;;  %v786_v46 = vadd.bf16 %v770_v38, %v738_v33 }
 0x18f   : > { %v773_v37 = vmul.bf16 %v1645_v34, %v741_v32  ;;  %v788_v47 = vadd.bf16 %v772_v44, %v740_v36 }
 0x190   : > { %v787_v39 = vadd.bf16 %v771_v35, %v739_v7 }
 0x191   : > { %v789_v45 = vadd.bf16 %v773_v37, %v741_v32 }
 0x192   : > { %1105 = vmatprep.mubr.bf16.mxu0 %v787_v39 }
 0x193   : > { %1170 = vmatprep.mubr.bf16.mxu1 %v789_v45 }
 0x194   : > { %v1647_v60 = vpop.eup %1646 }
 0x195   : > { %v1649_v48 = vpop.eup %1648  ;;  %1106 = vmatmul.mubr.bf16.gmra.mrb[24].mxu0 %v786_v46  ;;  %v774_v16 = vmul.bf16 %v1647_v60, %v742_v58 }
 0x196   : > { %v1651_v49 = vpop.eup %1650  ;;  %1171 = vmatmul.mubr.bf16.gmra.mrb[24].mxu1 %v788_v47  ;;  %v776_v54 = vmul.bf16 %v1649_v48, %v744_v51 }
 0x197   : > { %v1653_v22 = vpop.eup %1652  ;;  %v775_v40 = vmul.bf16 %v1651_v49, %v743_v61  ;;  %v790_v57 = vadd.bf16 %v774_v16, %v742_v58 }
 0x198   : > { %v777_v20 = vmul.bf16 %v1653_v22, %v745_v59  ;;  %v792_v63 = vadd.bf16 %v776_v54, %v744_v51 }
 0x199   : > { %v791_v55 = vadd.bf16 %v775_v40, %v743_v61 }
 0x19a   : > { %v793_v25 = vadd.bf16 %v777_v20, %v745_v59 }
 0x19b   : > { %1113 = vmatprep.mubr.bf16.mxu0 %v791_v55 }
 0x19c   : > { %1178 = vmatprep.mubr.bf16.mxu1 %v793_v25 }
 0x19d   : > { %1114 = vmatmul.mubr.bf16.gmra.mrb[28].mxu0 %v790_v57 }
 0x19e   : > { %1179 = vmatmul.mubr.bf16.gmra.mrb[28].mxu1 %v792_v63 }
 0x258   : > { %v1402_v50 = vpop.f32.mrb[16].mxu0 }
 0x259   : > { %v1442_v53 = vpop.f32.mrb[16].mxu1  ;;  %v1403_v56 = vpop.f32.mrb[17].mxu0 }
 0x25a   : > { %v1404_v21 = vadd.f32 %v1403_v56, %v1402_v50  ;;  %v1443_v0 = vpop.f32.mrb[17].mxu1  ;;  %v1405_v1 = vpop.f32.mrb[18].mxu0 }
 0x25b   : > { %v1444_v2 = vadd.f32 %v1443_v0, %v1442_v53  ;;  %v1445_v4 = vpop.f32.mrb[18].mxu1  ;;  %v1406_v5 = vpop.f32.mrb[19].mxu0 }
 0x25c   : > { %v1092_v6 = vadd.f32 %v1404_v21, %v2213_v52  ;;  %v1407_v42 = vadd.f32 %v1406_v5, %v1405_v1  ;;  %v1446_v62 = vpop.f32.mrb[19].mxu1 }
 0x25d   : > { %v1447_v8 = vadd.f32 %v1446_v62, %v1445_v4 }
 0x25e   : > { %v1157_v9 = vadd.f32 %v1444_v2, %v1092_v6  ;;  %v1095_v3 = vadd.f32 %v1407_v42, %v2213_v52 }
 0x260   : > { %1187 = vst [vmem:[%s2219_s12] sm:$0xff] %v1157_v9  ;;  %v1160_v12 = vadd.f32 %v1447_v8, %v1095_v3  ;;  %v1408_v41 = vpop.f32.mrb[20].mxu0 }
 0x261   : > { %v1448_v19 = vpop.f32.mrb[20].mxu1  ;;  %v1409_v13 = vpop.f32.mrb[21].mxu0 }
 0x262   : > { %1188 = vst [vmem:[%s2219_s12 + $0x8] sm:$0xff] %v1160_v12  ;;  %v1410_v17 = vadd.f32 %v1409_v13, %v1408_v41  ;;  %v1449_v18 = vpop.f32.mrb[21].mxu1  ;;  %v1411_v15 = vpop.f32.mrb[22].mxu0 }
 0x263   : > { %v1450_v43 = vadd.f32 %v1449_v18, %v1448_v19  ;;  %v1451_v23 = vpop.f32.mrb[22].mxu1  ;;  %v1412_v24 = vpop.f32.mrb[23].mxu0 }
 0x264   : > { %v1100_v26 = vadd.f32 %v1410_v17, %v2213_v52  ;;  %v1413_v27 = vadd.f32 %v1412_v24, %v1411_v15  ;;  %v1452_v10 = vpop.f32.mrb[23].mxu1 }
 0x265   : > { %v1453_v28 = vadd.f32 %v1452_v10, %v1451_v23 }
 0x266   : > { %v1165_v11 = vadd.f32 %v1450_v43, %v1100_v26  ;;  %v1103_v29 = vadd.f32 %v1413_v27, %v2213_v52 }
 0x268   : > { %1189 = vst [vmem:[%s2219_s12 + $0x10] sm:$0xff] %v1165_v11  ;;  %v1168_v30 = vadd.f32 %v1453_v28, %v1103_v29  ;;  %v1414_v14 = vpop.f32.mrb[24].mxu0 }
 0x269   : > { %v1454_v7 = vpop.f32.mrb[24].mxu1  ;;  %v1415_v31 = vpop.f32.mrb[25].mxu0 }
 0x26a   : > { %1190 = vst [vmem:[%s2219_s12 + $0x18] sm:$0xff] %v1168_v30  ;;  %v1416_v32 = vadd.f32 %v1415_v31, %v1414_v14  ;;  %v1455_v33 = vpop.f32.mrb[25].mxu1  ;;  %v1417_v34 = vpop.f32.mrb[26].mxu0 }
 0x26b   : > { %v1456_v35 = vadd.f32 %v1455_v33, %v1454_v7  ;;  %v1457_v36 = vpop.f32.mrb[26].mxu1  ;;  %v1418_v37 = vpop.f32.mrb[27].mxu0 }
 0x26c   : > { %v1108_v38 = vadd.f32 %v1416_v32, %v2213_v52  ;;  %v1419_v39 = vadd.f32 %v1418_v37, %v1417_v34  ;;  %v1458_v44 = vpop.f32.mrb[27].mxu1 }
 0x26d   : > { %v1459_v45 = vadd.f32 %v1458_v44, %v1457_v36 }
 0x26e   : > { %v1173_v46 = vadd.f32 %v1456_v35, %v1108_v38  ;;  %v1111_v60 = vadd.f32 %v1419_v39, %v2213_v52 }
 0x270   : > { %1191 = vst [vmem:[%s2219_s12 + $0x20] sm:$0xff] %v1173_v46  ;;  %v1176_v47 = vadd.f32 %v1459_v45, %v1111_v60  ;;  %v1420_v48 = vpop.f32.mrb[28].mxu0 }
 0x271   : > { %v1460_v61 = vpop.f32.mrb[28].mxu1  ;;  %v1421_v58 = vpop.f32.mrb[29].mxu0 }
 0x272   : > { %1192 = vst [vmem:[%s2219_s12 + $0x28] sm:$0xff] %v1176_v47  ;;  %v1422_v49 = vadd.f32 %v1421_v58, %v1420_v48  ;;  %v1461_v59 = vpop.f32.mrb[29].mxu1  ;;  %v1423_v51 = vpop.f32.mrb[30].mxu0 }
 0x273   : > { %v1462_v22 = vadd.f32 %v1461_v59, %v1460_v61  ;;  %v1463_v40 = vpop.f32.mrb[30].mxu1  ;;  %v1424_v16 = vpop.f32.mrb[31].mxu0 }
 0x274   : > { %v1116_v20 = vadd.f32 %v1422_v49, %v2213_v52  ;;  %v1425_v54 = vadd.f32 %v1424_v16, %v1423_v51  ;;  %v1464_v55 = vpop.f32.mrb[31].mxu1 }
 0x275   : > { %v1465_v25 = vadd.f32 %v1464_v55, %v1463_v40 }
 0x276   : > { %v1181_v57 = vadd.f32 %v1462_v22, %v1116_v20  ;;  %v1119_v63 = vadd.f32 %v1425_v54, %v2213_v52 }
 0x278   : > { %1193 = vst [vmem:[%s2219_s12 + $0x30] sm:$0xff] %v1181_v57  ;;  %v1184_v50 = vadd.f32 %v1465_v25, %v1119_v63 }
 0x27a   : > { %1194 = vst [vmem:[%s2219_s12 + $0x38] sm:$0xff] %v1184_v50 }
 0x27b   : > { %1753 = shalt.err (!%p1750_p2)
}
 0x27c   : > { %s1754_s6 = scalar_lea.hbm %s2240_s11, 1024  ;;  %s1758_s10 = scalar_lea.hbm %s2291_s5, 2048 }
 0x27d   : > { %p1755_p13 = scmp.ne.s32.totalorder %s2240_s11, %s1754_s6  ;;  %p1759_p4 = scmp.lt.u32.totalorder %s2240_s11, %s2291_s5 }
 0x27e   : > { %p1760_p7 = scmp.lt.u32.totalorder %s1758_s10, %s1754_s6  ;;  %p1762_p11 = scmp.lt.u32.totalorder %s1754_s6, %s2240_s11 }
 0x27f   : > { %p1756_p6 = pnand %p1755_p13, %p2305_p0 }
 0x280   : > { %p1761_p8 = por %p1760_p7, %p1759_p4 }
 0x281   : > { %p1757_p10 = pneg %p1756_p6 }
 0x282   : > { %p1763_p1 = por %p1762_p11, %p1761_p8 }
 0x284   : > { %p1764_p3 = pnand %p1763_p1, %p1757_p10 }
 0x286   : > { %1767 = shalt.err (!%p1764_p3)
}
 0x287   : > { %s1823_s29 = smov 128   ;;  %s1824_s8 = smov 8  }
 0x288   : > { %1476 = dma.vmem_to_hbm [thread:$0]  (%p2305_p0), %s2234_s13, 1024, %s2240_s11, %s1196_s14, %s1823_s29, %s1823_s29, %s1824_s8  }
 0x289 PF: > { %s1224_s9 = sand.u32 1, %s1798_s18   ;;  %p2306_p5 = scmp.ne.s32.totalorder %s2296_s25, 0 }
 0x28a   : > { %p2307_p9 = scmp.ge.s32.totalorder %s1810_s21, 2  ;;  %s1225_s15 = scalar_lea.sflag [#allocation4], %s1224_s9 }
 0x28c   : > { %p1490_p12 = pnand %p2307_p9, %p2306_p5 }
 0x28e   : > { %1793 = dma.done.wait (!%p1490_p12), %s1225_s15, 1024  }
 0x28f   : > { %1795 = vsyncadd (!%p1490_p12), %s1225_s15, 4294966272  ;;  %p19_p2 = scmp.ge.s32.totalorder %s1965_s16, 4   ;;  %s2308_s18 = smov %s1802_s19 }
 0x290   : > { %s2309_s19 = smov %s1806_s20  ;;  %s2310_s20 = smov %s1974_s27 }
 0x291   : > { %s2311_s21 = smov %s1965_s16  ;;  %21 = sbr.rel (!%p19_p2) target bundleno = 6 (0x6), region = 93 }
 0x298   :  { %1230 = vsyncpa [#allocation3], 1 }
 0x299   :  { %1232 = vsyncpa [#allocation3 + $0x1], 1 }
 0x29a   :  { %1233 = vsyncpa [#allocation6], 1 }
 0x29b   :  { %1234 = vsyncpa [#allocation4], 1 }
 0x29c   :  { %1236 = vsyncpa [#allocation4 + $0x1], 1 }

// kernel: tpu_custom_call.1
= control target key start
LH: loop header
LB: loop body
LE: loop exit
PB: predicated region body
PF: predicated region fallthrough
CT: control target
= control target key end

     0   :  { %10 = vsyncpa [#allocation3], 0  ;;  %s2286_s0 = inlined_call_operand.hbm [shape: f32[128,128], index: 0, kind: input, shape index: {}]   ;;  %s2287_s1 = inlined_call_operand.hbm [shape: bf16[128,512], index: 1, kind: input, shape index: {}]   ;;  %s2288_s2 = inlined_call_operand.vmem [shape: f32[1,512], index: 2, kind: input, shape index: {}]   ;;  %s2289_s3 = inlined_call_operand.hbm [shape: bf16[512,128], index: 3, kind: input, shape index: {}]   ;;  %s2290_s4 = inlined_call_operand.vmem [shape: f32[1,128], index: 4, kind: input, shape index: {}]   ;;  %s2291_s5 = inlined_call_operand.hbm [shape: f32[128,128], index: 5, kind: output, shape index: {}]  }
   0x1   :  { %12 = vsyncpa [#allocation3 + $0x1], 0 }
   0x2   :  { %13 = vsyncpa [#allocation6], 0 }
   0x3   :  { %14 = vsyncpa [#allocation4], 0 }
   0x4   :  { %16 = vsyncpa [#allocation4 + $0x1], 0  ;;  %s1855_s18 = smov 0   ;;  %s1857_s19 = smov 0  }
   0x5   :  { %s1859_s20 = smov 0   ;;  %s1861_s21 = smov 0  }
   0x6 LB: > { %s1876_s22 = sadd.s32 4294967295, %s1810_s21   ;;  %s1301_s23 = sadd.s32 4294967294, %s1810_s21   ;;  %s1810_s21 = sphi %s1861_s21, %s2311_s21   ;;  %s1806_s20 = sphi %s1859_s20, %s2310_s20   ;;  %s1802_s19 = sphi %s1857_s19, %s2309_s19   ;;  %s1798_s18 = sphi %s1855_s18, %s2308_s18  }
   0x7   : > { %p42_p0 = scmp.ne.s32.totalorder %s1802_s19, %s1798_s18  ;;  %p2292_p1 = scmp.eq.s32.totalorder %s1876_s22, 0 }
   0x8   : > { %p156_p3 = scmp.eq.s32.totalorder %s1301_s23, 1  ;;  %p1302_p5 = scmp.ge.s32.totalorder %s1810_s21, 1 }
   0x9   : > { %p1885_p4 = por %p2292_p1, %p42_p0  ;;  %p163_p7 = scmp.lt.s32.totalorder %s1810_s21, 3 }
   0xa   : > { %p1890_p6 = por %p156_p3, %p42_p0  ;;  %s1812_s27 = smov [#allocation5]  }
   0xb   : > { %s2295_s24 = scalar_select %p1885_p4, 1, 0 }
   0xc   : > { %s2296_s25 = scalar_select %p1890_p6, 1, 0 }
   0xd   : > { %p1895_p8 = pnand %p1302_p5, %p163_p7  ;;  %s175_s28 = sshll.u32 %s1812_s27, 4  ;;  %s1899_s28 = int_to_ptr.vmem [resolvable:$true] %s175_s28 }
   0xe   : > { %s1813_s30 = smov [#allocation7]   ;;  %s1654_s9 = scalar_lea.hbm %s2287_s1, 4096 }
   0xf   : > { %p1478_p9 = pneg %p1895_p8  ;;  %s191_s6 = sshll.u32 %s1813_s30, 4  ;;  %s1910_s6 = int_to_ptr.vmem [resolvable:$true] %s191_s6 }
  0x10   : > { %p1655_p12 = scmp.ne.s32.totalorder %s2287_s1, %s1654_s9  ;;  %p1661_p5 = scmp.lt.u32.totalorder %s1654_s9, %s2287_s1 }
  0x11   : > { %p1906_p11 = pnand %p1478_p9, %p2292_p1 }
  0x13   : > { %p1656_p13 = pneg %p1906_p11 }
  0x15   : > { %p1657_p0 = pnand %p1656_p13, %p1655_p12 }
  0x17   : > { %p1658_p3 = pneg %p1657_p0 }
  0x19   : > { %p1663_p7 = pnand %p1661_p5, %p1658_p3 }
  0x1b   : > { %1666 = shalt.err (!%p1663_p7)
}
  0x1c   : > { %s1667_s14 = scalar_lea.vmem %s1899_s28, 4096  ;;  %p1675_p2 = scmp.lt.s32.totalorder %s1899_s28, %s1899_s28 }
  0x1d   : > { %p1668_p9 = scmp.ne.s32.totalorder %s1899_s28, %s1667_s14  ;;  %p1676_p12 = scmp.lt.s32.totalorder %s1667_s14, %s1667_s14 }
  0x1f   : > { %p1670_p10 = pnand %p1668_p9, %p1656_p13  ;;  %p1677_p0 = por %p1676_p12, %p1675_p2 }
  0x21   : > { %p1671_p1 = pneg %p1670_p10 }
  0x23   : > { %p1678_p6 = pnand %p1677_p0, %p1671_p1 }
  0x25   : > { %1681 = shalt.err (!%p1678_p6)
}
  0x26   : > { %s1814_s15 = smov 256   ;;  %s1815_s16 = smov 16  }
  0x27   : > { %1481 = dma.hbm_to_vmem [thread:$0]  (!%p1906_p11), %s2287_s1, 4096, %s1899_s28, [#allocation6], %s1814_s15, %s1814_s15, %s1815_s16  }
  0x28   : > { %s1682_s7 = scalar_lea.hbm %s2289_s3, 4096 }
  0x29   : > { %p1683_p2 = scmp.ne.s32.totalorder %s2289_s3, %s1682_s7  ;;  %p1689_p10 = scmp.lt.u32.totalorder %s1682_s7, %s2289_s3 }
  0x2b   : > { %p1685_p1 = pnand %p1683_p2, %p1656_p13 }
  0x2d   : > { %p1686_p6 = pneg %p1685_p1 }
  0x2f   : > { %p1691_p3 = pnand %p1689_p10, %p1686_p6 }
  0x31   : > { %1694 = shalt.err (!%p1691_p3)
}
  0x32   : > { %s1695_s28 = scalar_lea.vmem %s1910_s6, 4096  ;;  %p1703_p12 = scmp.lt.s32.totalorder %s1910_s6, %s1910_s6 }
  0x33   : > { %p1696_p5 = scmp.ne.s32.totalorder %s1910_s6, %s1695_s28  ;;  %p1704_p0 = scmp.lt.s32.totalorder %s1695_s28, %s1695_s28 }
  0x35   : > { %p1698_p7 = pnand %p1696_p5, %p1656_p13  ;;  %p1705_p2 = por %p1704_p0, %p1703_p12 }
  0x37   : > { %p1699_p9 = pneg %p1698_p7 }
  0x39   : > { %p1706_p1 = pnand %p1705_p2, %p1699_p9 }
  0x3b   : > { %1709 = shalt.err (!%p1706_p1)
}
  0x3c   : > { %s1816_s12 = smov 64   ;;  %s1817_s13 = smov 4  }
  0x3d   : > { %1484 = dma.hbm_to_vmem [thread:$0]  (!%p1906_p11), %s2289_s3, 4096, %s1910_s6, [#allocation6], %s1816_s12, %s1816_s12, %s1817_s13  }
  0x3e   : > { %s1965_s16 = sadd.s32 1, %s1810_s21   ;;  %s29_s23 = sadd.s32 1, %s1806_s20 }
  0x3f   : > { %s26_s17 = ssub.s32 %s1810_s21, %s1965_s16  ;;  %p36_p6 = scmp.ne.s32.totalorder %s1806_s20, %s1802_s19 }
  0x40   : > { %p27_p13 = scmp.eq.s32.totalorder %s26_s17, 0  ;;  %p37_p10 = scmp.eq.s32.totalorder %s1810_s21, 0 }
  0x41   : > { %p2299_p5 = scmp.eq.s32.totalorder %s1876_s22, 1  ;;  %p1495_p9 = scmp.lt.s32.totalorder %s1810_s21, 2 }
  0x42   : > { %s1974_s27 = scalar_select %p27_p13, %s1806_s20, %s29_s23  }
  0x43   : > { %p38_p3 = por %p37_p10, %p36_p6  ;;  %p1978_p7 = por %p2299_p5, %p36_p6 }
  0x44   : > { %s208_s29 = sand.u32 1, %s1806_s20   ;;  %s1384_s6 = sshll.u32 %s1810_s21, 10 }
  0x45   : > { %s2300_s30 = scalar_select %p1978_p7, 1, 0 }
  0x46   : > { %s1306_s7 = sshll.u32 %s208_s29, 6  ;;  %s1988_s10 = scalar_lea.hbm %s2286_s0, %s1384_s6 }
  0x47   : > { %s212_s11 = scalar_lea.vmem [#allocation2], %s1306_s7  ;;  %p1992_p11 = pnand %p1495_p9, %p38_p3 }
  0x48   : > { %s219_s28 = sshll.u32 %s212_s11, 4  ;;  %s1996_s13 = scalar_lea.sflag [#allocation3], %s208_s29  ;;  %s1990_s28 = int_to_ptr.vmem [resolvable:$true] %s219_s28 }
  0x49   : > { %s1710_s14 = scalar_lea.hbm %s1988_s10, 1024  ;;  %p1712_p0 = pneg %p1992_p11 }
  0x4a   : > { %p1711_p12 = scmp.ne.s32.totalorder %s1988_s10, %s1710_s14  ;;  %s1715_s23 = scalar_lea.hbm %s2286_s0, 2048 }
  0x4b   : > { %p1716_p13 = scmp.lt.u32.totalorder %s1988_s10, %s2286_s0  ;;  %p1717_p6 = scmp.lt.u32.totalorder %s1715_s23, %s1710_s14 }
  0x4c   : > { %p1713_p2 = pnand %p1712_p0, %p1711_p12  ;;  %p1719_p3 = scmp.lt.u32.totalorder %s1710_s14, %s1988_s10 }
  0x4d   : > { %p1718_p10 = por %p1717_p6, %p1716_p13 }
  0x4e   : > { %p1714_p1 = pneg %p1713_p2 }
  0x4f   : > { %p1720_p5 = por %p1719_p3, %p1718_p10 }
  0x51   : > { %p1721_p9 = pnand %p1720_p5, %p1714_p1 }
  0x53   : > { %1724 = shalt.err (!%p1721_p9)
}
  0x54   : > { %s1725_s29 = scalar_lea.vmem %s1990_s28, 1024  ;;  %s1818_s8 = smov [#allocation2]  }
  0x55   : > { %p1726_p12 = scmp.ne.s32.totalorder %s1990_s28, %s1725_s29  ;;  %s1730_s9 = sshll.u32 %s1818_s8, 4  ;;  %s1731_s9 = int_to_ptr.vmem [resolvable:$false] %s1730_s9 }
  0x56   : > { %s1732_s11 = scalar_lea.vmem %s1731_s9, 2048  ;;  %p1733_p4 = scmp.lt.s32.totalorder %s1990_s28, %s1731_s9 }
  0x57   : > { %p1728_p2 = pnand %p1726_p12, %p1712_p0  ;;  %p1734_p13 = scmp.lt.s32.totalorder %s1732_s11, %s1725_s29 }
  0x59   : > { %p1729_p7 = pneg %p1728_p2  ;;  %p1735_p6 = por %p1734_p13, %p1733_p4 }
  0x5b   : > { %p1736_p10 = pnand %p1735_p6, %p1729_p7 }
  0x5d   : > { %1739 = shalt.err (!%p1736_p10)
}
  0x5e   : > { %s1819_s14 = smov 128   ;;  %s1820_s15 = smov 8  }
  0x5f   : > { %1488 = dma.hbm_to_vmem [thread:$0]  (!%p1992_p11), %s1988_s10, 1024, %s1990_s28, %s1996_s13, %s1819_s14, %s1819_s14, %s1820_s15  }
  0x60   : > { %231 = sbr.rel (%p1895_p8) target bundleno = 649 (0x289), region = 40  ;;  %s2027_s17 = sand.u32 (!%p1895_p8), 1, %s1802_s19  }
  0x61   : > { %s1310_s23 = sshll.u32 (!%p1895_p8), %s2027_s17, 6  ;;  %s234_s7 = scalar_lea.sflag (!%p1895_p8), [#allocation3], %s2027_s17 }
  0x62   : > { %s2033_s6 = scalar_lea.vmem (!%p1895_p8), [#allocation2], %s1310_s23  ;;  %p2302_p4 = scmp.ne.s32.totalorder (!%p1895_p8), %s2295_s24, 0 }
  0x67   : > { %1785 = dma.done.wait (%p2302_p4), %s234_s7, 1024  }
  0x68   : > { %1787 = vsyncadd (%p2302_p4), %s234_s7, 4294966272  ;;  %p2303_p7 = scmp.eq.s32.totalorder %s1876_s22, 0 }
  0x6a   : > { %1789 = dma.done.wait (%p2303_p7), [#allocation6], 8192   ;;  %p2304_p8 = pmov %p2303_p7 }
  0x6b   : > { %v1821_v0 = vmov 0   ;;  %v1542_v1 = vld [vmem:[#allocation5 + $0x4] ss:$16 sps:$4 sm:$0xff]   ;;  %v1544_v2 = vld [vmem:[#allocation5 + $0xc] ss:$16 sps:$4 sm:$0xff]   ;;  %s2219_s12 = scalar_lea.vmem [#allocation8], %s1310_s23 }
  0x6c   : > { %1791 = vsyncadd (%p2304_p8), [#allocation6], 4294959104  ;;  %536 = vmatprep.mubr.bf16.mxu0 %v1821_v0  ;;  %609 = vmatprep.mubr.bf16.mxu1 %v1821_v0  ;;  %v1546_v3 = vld [vmem:[#allocation5] ss:$16 sps:$4 sm:$0xff]   ;;  %v1547_v4 = vld [vmem:[#allocation5 + $0x8] ss:$16 sps:$4 sm:$0xff]  }
  0x6d   : > { %504 = vmatprep.subr.bf16.mxu0 %v1542_v1  ;;  %577 = vmatprep.subr.bf16.mxu1 %v1544_v2  ;;  %v1548_v5 = vld [vmem:[#allocation5 + $0x24] ss:$16 sps:$4 sm:$0xff]   ;;  %v1550_v6 = vld [vmem:[#allocation5 + $0x2c] ss:$16 sps:$4 sm:$0xff]   ;;  %v1552_v7 = vld [vmem:[#allocation5 + $0x20] ss:$16 sps:$4 sm:$0xff]  }
  0x6e   : > { %505 = vmatpush1.bf16.msra.mxu0 %v1546_v3  ;;  %578 = vmatpush1.bf16.msra.mxu1 %v1547_v4  ;;  %v1553_v8 = vld [vmem:[#allocation5 + $0x28] ss:$16 sps:$4 sm:$0xff]   ;;  %v1554_v9 = vld [vmem:[#allocation5 + $0x44] ss:$16 sps:$4 sm:$0xff]   ;;  %v1556_v10 = vld [vmem:[#allocation5 + $0x4c] ss:$16 sps:$4 sm:$0xff]  }
  0x6f   : > { %506 = vmatprep.subr.bf16.mxu0 %v1548_v5  ;;  %579 = vmatprep.subr.bf16.mxu1 %v1550_v6  ;;  %v1558_v11 = vld [vmem:[#allocation5 + $0x40] ss:$16 sps:$4 sm:$0xff]   ;;  %v1559_v12 = vld [vmem:[#allocation5 + $0x48] ss:$16 sps:$4 sm:$0xff]   ;;  %v1560_v13 = vld [vmem:[#allocation5 + $0x64] ss:$16 sps:$4 sm:$0xff]  }
  0x70   : > { %v1562_v14 = vld [vmem:[#allocation5 + $0x6c] ss:$16 sps:$4 sm:$0xff]   ;;  %v1564_v15 = vld [vmem:[#allocation5 + $0x60] ss:$16 sps:$4 sm:$0xff]   ;;  %v1565_v16 = vld [vmem:[#allocation5 + $0x68] ss:$16 sps:$4 sm:$0xff]  }
  0x71   : > { %v1566_v17 = vld [vmem:[#allocation5 + $0x84] ss:$16 sps:$4 sm:$0xff]   ;;  %v1568_v18 = vld [vmem:[#allocation5 + $0x8c] ss:$16 sps:$4 sm:$0xff]   ;;  %v1570_v19 = vld [vmem:[#allocation5 + $0x80] ss:$16 sps:$4 sm:$0xff]  }
  0x72   : > { %507 = vmatpush1.bf16.msra.mxu0 %v1552_v7  ;;  %580 = vmatpush1.bf16.msra.mxu1 %v1553_v8  ;;  %v1571_v20 = vld [vmem:[#allocation5 + $0x88] ss:$16 sps:$4 sm:$0xff]   ;;  %v1572_v21 = vld [vmem:[#allocation5 + $0xa4] ss:$16 sps:$4 sm:$0xff]   ;;  %v1574_v22 = vld [vmem:[#allocation5 + $0xac] ss:$16 sps:$4 sm:$0xff]  }
  0x73   : > { %508 = vmatprep.subr.bf16.mxu0 %v1554_v9  ;;  %581 = vmatprep.subr.bf16.mxu1 %v1556_v10  ;;  %v1576_v23 = vld [vmem:[#allocation5 + $0xa0] ss:$16 sps:$4 sm:$0xff]   ;;  %v1577_v24 = vld [vmem:[#allocation5 + $0xa8] ss:$16 sps:$4 sm:$0xff]   ;;  %v1578_v25 = vld [vmem:[#allocation5 + $0xc4] ss:$16 sps:$4 sm:$0xff]  }
  0x74   : > { %v1580_v26 = vld [vmem:[#allocation5 + $0xcc] ss:$16 sps:$4 sm:$0xff]   ;;  %v1582_v27 = vld [vmem:[#allocation5 + $0xc0] ss:$16 sps:$4 sm:$0xff]   ;;  %v1583_v28 = vld [vmem:[#allocation5 + $0xc8] ss:$16 sps:$4 sm:$0xff]  }
  0x75   : > { %v1584_v29 = vld [vmem:[#allocation5 + $0xe4] ss:$16 sps:$4 sm:$0xff]   ;;  %v1586_v30 = vld [vmem:[#allocation5 + $0xec] ss:$16 sps:$4 sm:$0xff]   ;;  %v1588_v31 = vld [vmem:[#allocation5 + $0xe0] ss:$16 sps:$4 sm:$0xff]  }
  0x76   : > { %509 = vmatpush1.bf16.msra.mxu0 %v1558_v11  ;;  %582 = vmatpush1.bf16.msra.mxu1 %v1559_v12  ;;  %v1589_v32 = vld [vmem:[#allocation5 + $0xe8] ss:$16 sps:$4 sm:$0xff]   ;;  %v278_v33 = vld [vmem:[%s2033_s6] sm:$0xff]  ;;  %v280_v36 = vld [vmem:[%s2033_s6 + $0x10] sm:$0xff]  ;;  %s1209_s13 = sshll.u32 %s2219_s12, 4  ;;  %s1385_s29 = sshll.u32 %s1876_s22, 10  ;;  %s2234_s13 = int_to_ptr.vmem [resolvable:$true] %s1209_s13 }
  0x77   : > { %510 = vmatprep.subr.bf16.mxu0 %v1560_v13  ;;  %583 = vmatprep.subr.bf16.mxu1 %v1562_v14  ;;  %v279_v34 = vld [vmem:[%s2033_s6 + $0x8] sm:$0xff]  ;;  %v281_v37 = vld [vmem:[%s2033_s6 + $0x18] sm:$0xff]  ;;  %v282_v39 = vld [vmem:[%s2033_s6 + $0x20] sm:$0xff]  ;;  %v324_v13 = vlaneseq  ;;  %s2240_s11 = scalar_lea.hbm %s2291_s5, %s1385_s29  ;;  %s1196_s14 = scalar_lea.sflag [#allocation4], %s2027_s17 }
  0x78   : > { %v286_v35 = vpack.c.bf16 %v279_v34, %v278_v33  ;;  %v287_v38 = vpack.c.bf16 %v281_v37, %v280_v36  ;;  %v283_v40 = vld [vmem:[%s2033_s6 + $0x28] sm:$0xff]  ;;  %v284_v42 = vld [vmem:[%s2033_s6 + $0x30] sm:$0xff]  ;;  %v285_v43 = vld [vmem:[%s2033_s6 + $0x38] sm:$0xff]  ;;  %s1740_s15 = scalar_lea.vmem %s2234_s13, 1024  ;;  %p2305_p0 = scmp.ne.s32.totalorder %s2300_s30, 0 }
  0x79   : > { %v288_v41 = vpack.c.bf16 %v283_v40, %v282_v39  ;;  %v289_v44 = vpack.c.bf16 %v285_v43, %v284_v42  ;;  %v1590_v45 = vld [vmem:[#allocation7 + $0x40] sm:$0xff]   ;;  %v1594_v49 = vld [vmem:[#allocation7 + $0x48] sm:$0xff]   ;;  %v1598_v53 = vld [vmem:[#allocation7 + $0x50] sm:$0xff]   ;;  %v325_v14 = vshrl.u32 %v324_v13, 7  ;;  %p1741_p11 = scmp.ne.s32.totalorder %s2234_s13, %s1740_s15  ;;  %s1822_s22 = smov [#allocation8]  }
  0x7a   : > { %511 = vmatpush1.bf16.msra.mxu0 %v1564_v15  ;;  %584 = vmatpush1.bf16.msra.mxu1 %v1565_v16  ;;  %v1592_v46 = vld [vmem:[#allocation7 + $0xc0] sm:$0xff]   ;;  %v1596_v50 = vld [vmem:[#allocation7 + $0xc8] sm:$0xff]   ;;  %v1600_v54 = vld [vmem:[#allocation7 + $0xd0] sm:$0xff]   ;;  %s1744_s23 = sshll.u32 %s1822_s22, 4  ;;  %s1745_s23 = int_to_ptr.vmem [resolvable:$false] %s1744_s23 }
  0x7b   : > { %512 = vmatprep.subr.bf16.mxu0 %v1566_v17  ;;  %585 = vmatprep.subr.bf16.mxu1 %v1568_v18  ;;  %v1591_v47 = vld [vmem:[#allocation7] sm:$0xff]   ;;  %v1595_v51 = vld [vmem:[#allocation7 + $0x8] sm:$0xff]   ;;  %v1599_v55 = vld [vmem:[#allocation7 + $0x10] sm:$0xff]   ;;  %v334_v15 = vsub.s32 2, %v325_v14  ;;  %v338_v16 = vsub.s32 3, %v325_v14  ;;  %v326_v17 = vsub.s32 0, %v325_v14  ;;  %p1742_p1 = pnand %p1741_p11, %p2305_p0  ;;  %p1747_p5 = scmp.lt.s32.totalorder %s2234_s13, %s1745_s23 }
  0x7c   : > { %v1593_v48 = vld [vmem:[#allocation7 + $0x80] sm:$0xff]   ;;  %v1597_v52 = vld [vmem:[#allocation7 + $0x88] sm:$0xff]   ;;  %v1601_v56 = vld [vmem:[#allocation7 + $0x90] sm:$0xff]   ;;  %s1746_s7 = scalar_lea.vmem %s1745_s23, 2048 }
  0x7d   : > { %v1602_v57 = vld [vmem:[#allocation7 + $0x58] sm:$0xff]   ;;  %v1606_v61 = vld [vmem:[#allocation7 + $0x60] sm:$0xff]   ;;  %v1610_v1 = vld [vmem:[#allocation7 + $0x68] sm:$0xff]   ;;  %p1743_p3 = pneg %p1742_p1  ;;  %p1748_p9 = scmp.lt.s32.totalorder %s1746_s7, %s1740_s15 }
  0x7e   : > { %513 = vmatpush1.bf16.msra.mxu0 %v1570_v19  ;;  %586 = vmatpush1.bf16.msra.mxu1 %v1571_v20  ;;  %v1604_v58 = vld [vmem:[#allocation7 + $0xd8] sm:$0xff]   ;;  %v1608_v62 = vld [vmem:[#allocation7 + $0xe0] sm:$0xff]   ;;  %v1612_v2 = vld [vmem:[#allocation7 + $0xe8] sm:$0xff]   ;;  %v330_v19 = vsub.s32 1, %v325_v14 }
  0x7f   : > { %514 = vmatprep.subr.bf16.mxu0 %v1572_v21  ;;  %587 = vmatprep.subr.bf16.mxu1 %v1574_v22  ;;  %v1603_v59 = vld [vmem:[#allocation7 + $0x18] sm:$0xff]   ;;  %v1607_v63 = vld [vmem:[#allocation7 + $0x20] sm:$0xff]   ;;  %v1611_v3 = vld [vmem:[#allocation7 + $0x28] sm:$0xff]   ;;  %p1749_p12 = por %p1748_p9, %p1747_p5 }
  0x80   : > { %v1605_v60 = vld [vmem:[#allocation7 + $0x98] sm:$0xff]   ;;  %v1613_v4 = vld [vmem:[#allocation7 + $0xa8] sm:$0xff]   ;;  %v1614_v5 = vld [vmem:[#allocation7 + $0x70] sm:$0xff]  }
  0x81   : > { %v1616_v6 = vld [vmem:[#allocation7 + $0xf0] sm:$0xff]   ;;  %v1618_v9 = vld [vmem:[#allocation7 + $0x78] sm:$0xff]   ;;  %v322_v18 = vld [vmem:[%s2288_s2] sm:$0xf]  ;;  %p1750_p2 = pnand %p1749_p12, %p1743_p3 }
  0x82   : > { %515 = vmatpush1.bf16.msra.mxu0 %v1576_v23  ;;  %588 = vmatpush1.bf16.msra.mxu1 %v1577_v24  ;;  %v1615_v7 = vld [vmem:[#allocation7 + $0x30] sm:$0xff]   ;;  %v1620_v10 = vld [vmem:[#allocation7 + $0xf8] sm:$0xff]   ;;  %v2062_v20 = vrot.slane %v322_v18, %v334_v15  ;;  %v2064_v21 = vrot.slane %v322_v18, %v338_v16  ;;  %v2066_v22 = vrot.slane %v322_v18, %v326_v17 }
  0x83   : > { %516 = vmatprep.subr.bf16.mxu0 %v1578_v25  ;;  %589 = vmatprep.subr.bf16.mxu1 %v1580_v26  ;;  %v1617_v8 = vld [vmem:[#allocation7 + $0xb0] sm:$0xff]   ;;  %v1619_v11 = vld [vmem:[#allocation7 + $0x38] sm:$0xff]   ;;  %v2068_v25 = vrot.slane %v322_v18, %v330_v19 }
  0x84   : > { %v1621_v12 = vld [vmem:[#allocation7 + $0xb8] sm:$0xff]  }
  0x86   : > { %517 = vmatpush1.bf16.msra.mxu0 %v1582_v27  ;;  %590 = vmatpush1.bf16.msra.mxu1 %v1583_v28 }
  0x87   : > { %518 = vmatprep.subr.bf16.mxu0 %v1584_v29  ;;  %591 = vmatprep.subr.bf16.mxu1 %v1586_v30 }
  0x8a   : > { %519 = vmatpush1.bf16.msra.mxu0 %v1588_v31  ;;  %592 = vmatpush1.bf16.msra.mxu1 %v1589_v32 }
  0x8b   : > { %1386 = vmatprep.subr.bf16.mxu0 %v1590_v45  ;;  %1426 = vmatprep.subr.bf16.mxu1 %v1592_v46 }
  0x8d   : > { %537 = vmatmul.mubr.bf16.vlgmr.msra.gmra.mrb[0].mxu0 %v286_v35  ;;  %610 = vmatmul.mubr.bf16.vlgmr.msra.gmra.mrb[0].mxu1 %v286_v35 }
  0x8e   : > { %546 = vmatprep.mubr.bf16.mxu0 %v1821_v0  ;;  %619 = vmatprep.mubr.bf16.mxu1 %v1821_v0 }
  0x8f   : > { %1387 = vmatpush3.bf16.msra.mxu0 %v1591_v47  ;;  %1427 = vmatpush3.bf16.msra.mxu1 %v1593_v48 }
  0x90   : > { %1388 = vmatprep.subr.bf16.mxu0 %v1594_v49  ;;  %1428 = vmatprep.subr.bf16.mxu1 %v1596_v50 }
  0x93   : > { %1389 = vmatpush3.bf16.msra.mxu0 %v1595_v51  ;;  %1429 = vmatpush3.bf16.msra.mxu1 %v1597_v52 }
  0x94   : > { %1390 = vmatprep.subr.bf16.mxu0 %v1598_v53  ;;  %1430 = vmatprep.subr.bf16.mxu1 %v1600_v54 }
  0x95   : > { %547 = vmatmul.mubr.bf16.gmra.mrb[4].mxu0 %v287_v38  ;;  %620 = vmatmul.mubr.bf16.gmra.mrb[4].mxu1 %v287_v38 }
  0x96   : > { %556 = vmatprep.mubr.bf16.mxu0 %v1821_v0  ;;  %629 = vmatprep.mubr.bf16.mxu1 %v1821_v0 }
  0x97   : > { %1391 = vmatpush3.bf16.msra.mxu0 %v1599_v55  ;;  %1431 = vmatpush3.bf16.msra.mxu1 %v1601_v56 }
  0x98   : > { %1392 = vmatprep.subr.bf16.mxu0 %v1602_v57  ;;  %1432 = vmatprep.subr.bf16.mxu1 %v1604_v58 }
  0x9b   : > { %1393 = vmatpush3.bf16.msra.mxu0 %v1603_v59  ;;  %1433 = vmatpush3.bf16.msra.mxu1 %v1605_v60 }
  0x9c   : > { %1394 = vmatprep.subr.bf16.mxu0 %v1606_v61  ;;  %1434 = vmatprep.subr.bf16.mxu1 %v1608_v62 }
  0x9d   : > { %557 = vmatmul.mubr.bf16.gmra.mrb[8].mxu0 %v288_v41  ;;  %630 = vmatmul.mubr.bf16.gmra.mrb[8].mxu1 %v288_v41 }
  0x9e   : > { %566 = vmatprep.mubr.bf16.mxu0 %v1821_v0  ;;  %639 = vmatprep.mubr.bf16.mxu1 %v1821_v0  ;;  %v1609_v0 = vld [vmem:[#allocation7 + $0xa0] sm:$0xff]  }
  0x9f   : > { %1395 = vmatpush3.bf16.msra.mxu0 %v1607_v63  ;;  %1435 = vmatpush3.bf16.msra.mxu1 %v1609_v0 }
  0xa0   : > { %1396 = vmatprep.subr.bf16.mxu0 %v1610_v1  ;;  %1436 = vmatprep.subr.bf16.mxu1 %v1612_v2 }
  0xa3   : > { %1397 = vmatpush3.bf16.msra.mxu0 %v1611_v3  ;;  %1437 = vmatpush3.bf16.msra.mxu1 %v1613_v4 }
  0xa4   : > { %1398 = vmatprep.subr.bf16.mxu0 %v1614_v5  ;;  %1438 = vmatprep.subr.bf16.mxu1 %v1616_v6 }
  0xa5   : > { %567 = vmatmul.mubr.bf16.gmra.mrb[12].mxu0 %v289_v44  ;;  %640 = vmatmul.mubr.bf16.gmra.mrb[12].mxu1 %v289_v44 }
  0xa7   : > { %1399 = vmatpush3.bf16.msra.mxu0 %v1615_v7  ;;  %1439 = vmatpush3.bf16.msra.mxu1 %v1617_v8 }
  0xa8   : > { %1400 = vmatprep.subr.bf16.mxu0 %v1618_v9  ;;  %1440 = vmatprep.subr.bf16.mxu1 %v1620_v10 }
  0xab   : > { %1401 = vmatpush3.bf16.msra.mxu0 %v1619_v11  ;;  %1441 = vmatpush3.bf16.msra.mxu1 %v1621_v12 }
 0x160   : > { %v538_v23 = vpop.f32.mrb[0].mxu0  ;;  %v611_v24 = vpop.f32.mrb[0].mxu1 }
 0x161   : > { %v612_v26 = vadd.f32 %v611_v24, %v2062_v20  ;;  %v540_v27 = vpop.f32.mrb[1].mxu0  ;;  %v613_v28 = vpop.f32.mrb[1].mxu1  ;;  %v539_v32 = vadd.f32 %v538_v23, %v2066_v22 }
 0x162   : > { %v614_v29 = vadd.f32 %v613_v28, %v2064_v21  ;;  %v542_v30 = vpop.f32.mrb[2].mxu0  ;;  %v615_v31 = vpop.f32.mrb[2].mxu1  ;;  %v541_v37 = vadd.f32 %v540_v27, %v2068_v25 }
 0x163   : > { %v543_v33 = vadd.f32 %v542_v30, %v2066_v22  ;;  %v616_v34 = vadd.f32 %v615_v31, %v2062_v20  ;;  %v544_v35 = vpop.f32.mrb[3].mxu0  ;;  %v617_v36 = vpop.f32.mrb[3].mxu1 }
 0x164   : > { %v545_v38 = vadd.f32 %v544_v35, %v2068_v25  ;;  %v618_v39 = vadd.f32 %v617_v36, %v2064_v21 }
 0x165   : > { %v2078_v40 = vpack.c.bf16 %v543_v33, %v539_v32  ;;  %v2080_v41 = vpack.c.bf16 %v616_v34, %v612_v26 }
 0x166   : > { %v2082_v42 = vpack.c.bf16 %v545_v38, %v541_v37  ;;  %v2084_v43 = vpack.c.bf16 %v618_v39, %v614_v29 }
 0x167   : > { %v666_v44 = vmul.bf16 %v2078_v40, %v2078_v40  ;;  %v668_v45 = vmul.bf16 %v2080_v41, %v2080_v41  ;;  %v730_v16 = vmul.bf16 1056980736, %v2078_v40  ;;  %v732_v19 = vmul.bf16 1056980736, %v2080_v41 }
 0x168   : > { %v667_v46 = vmul.bf16 %v2082_v42, %v2082_v42  ;;  %v669_v47 = vmul.bf16 %v2084_v43, %v2084_v43  ;;  %v548_v48 = vpop.f32.mrb[4].mxu0  ;;  %v621_v49 = vpop.f32.mrb[4].mxu1 }
 0x169   : > { %v682_v50 = vmul.bf16 1024605458, %v666_v44  ;;  %v684_v51 = vmul.bf16 1024605458, %v668_v45  ;;  %v549_v52 = vadd.f32 %v548_v48, %v2066_v22  ;;  %v622_v53 = vadd.f32 %v621_v49, %v2062_v20  ;;  %v550_v54 = vpop.f32.mrb[5].mxu0  ;;  %v623_v55 = vpop.f32.mrb[5].mxu1 }
 0x16a   : > { %v683_v56 = vmul.bf16 1024605458, %v667_v46  ;;  %v685_v57 = vmul.bf16 1024605458, %v669_v47  ;;  %v551_v58 = vadd.f32 %v550_v54, %v2068_v25  ;;  %v624_v59 = vadd.f32 %v623_v55, %v2064_v21  ;;  %v552_v60 = vpop.f32.mrb[6].mxu0  ;;  %v625_v61 = vpop.f32.mrb[6].mxu1 }
 0x16b   : > { %v698_v62 = vadd.bf16 1061961548, %v682_v50  ;;  %v700_v63 = vadd.bf16 1061961548, %v684_v51  ;;  %v553_v0 = vadd.f32 %v552_v60, %v2066_v22  ;;  %v626_v1 = vadd.f32 %v625_v61, %v2062_v20  ;;  %v554_v2 = vpop.f32.mrb[7].mxu0  ;;  %v627_v3 = vpop.f32.mrb[7].mxu1 }
 0x16c   : > { %v699_v4 = vadd.bf16 1061961548, %v683_v56  ;;  %v701_v5 = vadd.bf16 1061961548, %v685_v57  ;;  %v555_v6 = vadd.f32 %v554_v2, %v2068_v25  ;;  %v628_v7 = vadd.f32 %v627_v3, %v2064_v21 }
 0x16d   : > { %v714_v8 = vmul.bf16 %v698_v62, %v2078_v40  ;;  %v716_v9 = vmul.bf16 %v700_v63, %v2080_v41  ;;  %v2104_v10 = vpack.c.bf16 %v553_v0, %v549_v52  ;;  %v2106_v11 = vpack.c.bf16 %v626_v1, %v622_v53 }
 0x16e   : > { %v715_v12 = vmul.bf16 %v699_v4, %v2082_v42  ;;  %v717_v13 = vmul.bf16 %v701_v5, %v2084_v43  ;;  %v2110_v14 = vpack.c.bf16 %v555_v6, %v551_v58  ;;  %v2112_v15 = vpack.c.bf16 %v628_v7, %v624_v59 }
 0x16f   : > { %1622 = vtanh.bf16 %v714_v8  ;;  %v670_v17 = vmul.bf16 %v2104_v10, %v2104_v10  ;;  %v672_v18 = vmul.bf16 %v2106_v11, %v2106_v11  ;;  %v731_v62 = vmul.bf16 1056980736, %v2082_v42 }
 0x170   : > { %1624 = vtanh.bf16 %v716_v9  ;;  %v671_v23 = vmul.bf16 %v2110_v14, %v2110_v14  ;;  %v673_v24 = vmul.bf16 %v2112_v15, %v2112_v15  ;;  %v558_v26 = vpop.f32.mrb[8].mxu0  ;;  %v631_v27 = vpop.f32.mrb[8].mxu1  ;;  %v733_v3 = vmul.bf16 1056980736, %v2084_v43 }
 0x171   : > { %1626 = vtanh.bf16 %v715_v12  ;;  %v686_v28 = vmul.bf16 1024605458, %v670_v17  ;;  %v688_v29 = vmul.bf16 1024605458, %v672_v18  ;;  %v559_v30 = vadd.f32 %v558_v26, %v2066_v22  ;;  %v560_v31 = vpop.f32.mrb[9].mxu0  ;;  %v633_v32 = vpop.f32.mrb[9].mxu1 }
 0x172   : > { %1628 = vtanh.bf16 %v717_v13  ;;  %v687_v33 = vmul.bf16 1024605458, %v671_v23  ;;  %v689_v34 = vmul.bf16 1024605458, %v673_v24  ;;  %v632_v35 = vadd.f32 %v631_v27, %v2062_v20  ;;  %v562_v36 = vpop.f32.mrb[10].mxu0  ;;  %v635_v37 = vpop.f32.mrb[10].mxu1 }
 0x173   : > { %v702_v38 = vadd.bf16 1061961548, %v686_v28  ;;  %v704_v39 = vadd.bf16 1061961548, %v688_v29  ;;  %v561_v44 = vadd.f32 %v560_v31, %v2068_v25  ;;  %v634_v45 = vadd.f32 %v633_v32, %v2064_v21  ;;  %v564_v46 = vpop.f32.mrb[11].mxu0  ;;  %v637_v47 = vpop.f32.mrb[11].mxu1 }
 0x174   : > { %v703_v48 = vadd.bf16 1061961548, %v687_v33  ;;  %v705_v49 = vadd.bf16 1061961548, %v689_v34  ;;  %v563_v50 = vadd.f32 %v562_v36, %v2066_v22  ;;  %v636_v51 = vadd.f32 %v635_v37, %v2062_v20 }
 0x175   : > { %v718_v52 = vmul.bf16 %v702_v38, %v2104_v10  ;;  %v720_v53 = vmul.bf16 %v704_v39, %v2106_v11  ;;  %v565_v54 = vadd.f32 %v564_v46, %v2068_v25  ;;  %v638_v55 = vadd.f32 %v637_v47, %v2064_v21 }
 0x176   : > { %v719_v56 = vmul.bf16 %v703_v48, %v2110_v14  ;;  %v721_v57 = vmul.bf16 %v705_v49, %v2112_v15  ;;  %v2136_v58 = vpack.c.bf16 %v563_v50, %v559_v30  ;;  %v2138_v59 = vpack.c.bf16 %v636_v51, %v632_v35 }
 0x177   : > { %1630 = vtanh.bf16 %v718_v52  ;;  %v2140_v60 = vpack.c.bf16 %v565_v54, %v561_v44  ;;  %v2142_v61 = vpack.c.bf16 %v638_v55, %v634_v45  ;;  %v735_v7 = vmul.bf16 1056980736, %v2110_v14 }
 0x178   : > { %1632 = vtanh.bf16 %v720_v53  ;;  %v674_v63 = vmul.bf16 %v2136_v58, %v2136_v58  ;;  %v676_v0 = vmul.bf16 %v2138_v59, %v2138_v59  ;;  %v568_v1 = vpop.f32.mrb[12].mxu0  ;;  %v641_v2 = vpop.f32.mrb[12].mxu1 }
 0x179   : > { %1634 = vtanh.bf16 %v719_v56  ;;  %v675_v4 = vmul.bf16 %v2140_v60, %v2140_v60  ;;  %v677_v5 = vmul.bf16 %v2142_v61, %v2142_v61  ;;  %v570_v6 = vpop.f32.mrb[13].mxu0  ;;  %v643_v42 = vpop.f32.mrb[13].mxu1  ;;  %v569_v13 = vadd.f32 %v568_v1, %v2066_v22 }
 0x17a   : > { %v1623_v8 = vpop.eup %1622  ;;  %1636 = vtanh.bf16 %v721_v57  ;;  %v690_v9 = vmul.bf16 1024605458, %v674_v63  ;;  %v692_v12 = vmul.bf16 1024605458, %v676_v0  ;;  %v572_v17 = vpop.f32.mrb[14].mxu0  ;;  %v642_v27 = vadd.f32 %v641_v2, %v2062_v20 }
 0x17b   : > { %v645_v18 = vpop.f32.mrb[14].mxu1  ;;  %v1625_v43 = vpop.eup %1624  ;;  %v762_v23 = vmul.bf16 %v1623_v8, %v730_v16  ;;  %v691_v24 = vmul.bf16 1024605458, %v675_v4  ;;  %v693_v26 = vmul.bf16 1024605458, %v677_v5  ;;  %v571_v34 = vadd.f32 %v570_v6, %v2068_v25 }
 0x17c   : > { %v574_v28 = vpop.f32.mrb[15].mxu0  ;;  %v647_v29 = vpop.f32.mrb[15].mxu1  ;;  %v764_v31 = vmul.bf16 %v1625_v43, %v732_v19  ;;  %v706_v32 = vadd.bf16 1061961548, %v690_v9  ;;  %v708_v33 = vadd.bf16 1061961548, %v692_v12  ;;  %v644_v38 = vadd.f32 %v643_v42, %v2064_v21 }
 0x17d   : > { %v1627_v30 = vpop.eup %1626  ;;  %v707_v36 = vadd.bf16 1061961548, %v691_v24  ;;  %v709_v37 = vadd.bf16 1061961548, %v693_v26  ;;  %v573_v39 = vadd.f32 %v572_v17, %v2066_v22  ;;  %v778_v44 = vadd.bf16 %v762_v23, %v730_v16 }
 0x17e   : > { %v1629_v35 = vpop.eup %1628  ;;  %v722_v45 = vmul.bf16 %v706_v32, %v2136_v58  ;;  %v724_v46 = vmul.bf16 %v708_v33, %v2138_v59  ;;  %v646_v47 = vadd.f32 %v645_v18, %v2062_v20  ;;  %v575_v51 = vadd.f32 %v574_v28, %v2068_v25 }
 0x17f   : > { %v723_v48 = vmul.bf16 %v707_v36, %v2140_v60  ;;  %v725_v49 = vmul.bf16 %v709_v37, %v2142_v61  ;;  %v2171_v50 = vpack.c.bf16 %v573_v39, %v569_v13  ;;  %v648_v22 = vadd.f32 %v647_v29, %v2064_v21 }
 0x180   : > { %1638 = vtanh.bf16 %v722_v45  ;;  %v2174_v52 = vpack.c.bf16 %v646_v47, %v642_v27  ;;  %v763_v40 = vmul.bf16 %v1627_v30, %v731_v62  ;;  %v2179_v53 = vpack.c.bf16 %v575_v51, %v571_v34 }
 0x181   : > { %1640 = vtanh.bf16 %v724_v46  ;;  %v678_v16 = vmul.bf16 %v2171_v50, %v2171_v50  ;;  %v765_v20 = vmul.bf16 %v1629_v35, %v733_v3  ;;  %v2183_v56 = vpack.c.bf16 %v648_v22, %v644_v38 }
 0x182   : > { %v1631_v54 = vpop.eup %1630  ;;  %1642 = vtanh.bf16 %v723_v48  ;;  %v680_v55 = vmul.bf16 %v2174_v52, %v2174_v52  ;;  %v779_v25 = vadd.bf16 %v763_v40, %v731_v62  ;;  %v679_v21 = vmul.bf16 %v2179_v53, %v2179_v53 }
 0x183   : > { %v1633_v57 = vpop.eup %1632  ;;  %1644 = vtanh.bf16 %v725_v49  ;;  %v694_v63 = vmul.bf16 1024605458, %v678_v16  ;;  %v781_v0 = vadd.bf16 %v765_v20, %v733_v3  ;;  %v780_v2 = vadd.bf16 %v764_v31, %v732_v19 }
 0x184   : > { %v1635_v1 = vpop.eup %1634  ;;  %v696_v4 = vmul.bf16 1024605458, %v680_v55  ;;  %v681_v5 = vmul.bf16 %v2183_v56, %v2183_v56  ;;  %1089 = vmatprep.mubr.bf16.mxu0 %v779_v25  ;;  %v737_v6 = vmul.bf16 1056980736, %v2112_v15  ;;  %v695_v8 = vmul.bf16 1024605458, %v679_v21 }
 0x185   : > { %v1637_v42 = vpop.eup %1636  ;;  %v710_v62 = vadd.bf16 1061961548, %v694_v63  ;;  %1154 = vmatprep.mubr.bf16.mxu1 %v781_v0  ;;  %1090 = vmatmul.mubr.bf16.vlgmr.msra.gmra.mrb[16].mxu0 %v778_v44  ;;  %v767_v9 = vmul.bf16 %v1635_v1, %v735_v7  ;;  %v734_v3 = vmul.bf16 1056980736, %v2104_v10  ;;  %v736_v13 = vmul.bf16 1056980736, %v2106_v11 }
 0x186   : > { %v712_v12 = vadd.bf16 1061961548, %v696_v4  ;;  %v697_v41 = vmul.bf16 1024605458, %v681_v5  ;;  %1155 = vmatmul.mubr.bf16.vlgmr.msra.gmra.mrb[16].mxu1 %v780_v2  ;;  %v769_v19 = vmul.bf16 %v1637_v42, %v737_v6  ;;  %v711_v18 = vadd.bf16 1061961548, %v695_v8 }
 0x187   : > { %v726_v17 = vmul.bf16 %v710_v62, %v2171_v50  ;;  %v783_v15 = vadd.bf16 %v767_v9, %v735_v7  ;;  %v766_v43 = vmul.bf16 %v1631_v54, %v734_v3  ;;  %v768_v27 = vmul.bf16 %v1633_v57, %v736_v13 }
 0x188   : > { %v728_v23 = vmul.bf16 %v712_v12, %v2174_v52  ;;  %v713_v24 = vadd.bf16 1061961548, %v697_v41  ;;  %v785_v26 = vadd.bf16 %v769_v19, %v737_v6  ;;  %v727_v10 = vmul.bf16 %v711_v18, %v2179_v53 }
 0x189   : > { %1646 = vtanh.bf16 %v726_v17  ;;  %1097 = vmatprep.mubr.bf16.mxu0 %v783_v15  ;;  %v782_v29 = vadd.bf16 %v766_v43, %v734_v3  ;;  %v784_v14 = vadd.bf16 %v768_v27, %v736_v13  ;;  %v739_v7 = vmul.bf16 1056980736, %v2140_v60 }
 0x18a   : > { %1648 = vtanh.bf16 %v728_v23  ;;  %v729_v28 = vmul.bf16 %v713_v24, %v2183_v56  ;;  %1162 = vmatprep.mubr.bf16.mxu1 %v785_v26  ;;  %v741_v32 = vmul.bf16 1056980736, %v2142_v61  ;;  %v738_v33 = vmul.bf16 1056980736, %v2136_v58 }
 0x18b   : > { %v1639_v11 = vpop.eup %1638  ;;  %1650 = vtanh.bf16 %v727_v10  ;;  %v740_v36 = vmul.bf16 1056980736, %v2138_v59  ;;  %v743_v61 = vmul.bf16 1056980736, %v2179_v53  ;;  %v742_v58 = vmul.bf16 1056980736, %v2171_v50 }
 0x18c   : > { %v1641_v30 = vpop.eup %1640  ;;  %1652 = vtanh.bf16 %v729_v28  ;;  %v770_v38 = vmul.bf16 %v1639_v11, %v738_v33  ;;  %v745_v59 = vmul.bf16 1056980736, %v2183_v56  ;;  %v744_v51 = vmul.bf16 1056980736, %v2174_v52  ;;  %v2213_v52 = vld [vmem:[%s2290_s4] ss:$0 sm:$0xff] }
 0x18d   : > { %v1643_v31 = vpop.eup %1642  ;;  %1098 = vmatmul.mubr.bf16.gmra.mrb[20].mxu0 %v782_v29  ;;  %v772_v44 = vmul.bf16 %v1641_v30, %v740_v36 }
 0x18e   : > { %v1645_v34 = vpop.eup %1644  ;;  %1163 = vmatmul.mubr.bf16.gmra.mrb[20].mxu1 %v784_v14  ;;  %v771_v35 = vmul.bf16 %v1643_v31, %v739_v7  ;;  %v786_v46 = vadd.bf16 %v770_v38, %v738_v33 }
 0x18f   : > { %v773_v37 = vmul.bf16 %v1645_v34, %v741_v32  ;;  %v788_v47 = vadd.bf16 %v772_v44, %v740_v36 }
 0x190   : > { %v787_v39 = vadd.bf16 %v771_v35, %v739_v7 }
 0x191   : > { %v789_v45 = vadd.bf16 %v773_v37, %v741_v32 }
 0x192   : > { %1105 = vmatprep.mubr.bf16.mxu0 %v787_v39 }
 0x193   : > { %1170 = vmatprep.mubr.bf16.mxu1 %v789_v45 }
 0x194   : > { %v1647_v60 = vpop.eup %1646 }
 0x195   : > { %v1649_v48 = vpop.eup %1648  ;;  %1106 = vmatmul.mubr.bf16.gmra.mrb[24].mxu0 %v786_v46  ;;  %v774_v16 = vmul.bf16 %v1647_v60, %v742_v58 }
 0x196   : > { %v1651_v49 = vpop.eup %1650  ;;  %1171 = vmatmul.mubr.bf16.gmra.mrb[24].mxu1 %v788_v47  ;;  %v776_v54 = vmul.bf16 %v1649_v48, %v744_v51 }
 0x197   : > { %v1653_v22 = vpop.eup %1652  ;;  %v775_v40 = vmul.bf16 %v1651_v49, %v743_v61  ;;  %v790_v57 = vadd.bf16 %v774_v16, %v742_v58 }
 0x198   : > { %v777_v20 = vmul.bf16 %v1653_v22, %v745_v59  ;;  %v792_v63 = vadd.bf16 %v776_v54, %v744_v51 }
 0x199   : > { %v791_v55 = vadd.bf16 %v775_v40, %v743_v61 }
 0x19a   : > { %v793_v25 = vadd.bf16 %v777_v20, %v745_v59 }
 0x19b   : > { %1113 = vmatprep.mubr.bf16.mxu0 %v791_v55 }
 0x19c   : > { %1178 = vmatprep.mubr.bf16.mxu1 %v793_v25 }
 0x19d   : > { %1114 = vmatmul.mubr.bf16.gmra.mrb[28].mxu0 %v790_v57 }
 0x19e   : > { %1179 = vmatmul.mubr.bf16.gmra.mrb[28].mxu1 %v792_v63 }
 0x258   : > { %v1402_v50 = vpop.f32.mrb[16].mxu0 }
 0x259   : > { %v1442_v53 = vpop.f32.mrb[16].mxu1  ;;  %v1403_v56 = vpop.f32.mrb[17].mxu0 }
 0x25a   : > { %v1404_v21 = vadd.f32 %v1403_v56, %v1402_v50  ;;  %v1443_v0 = vpop.f32.mrb[17].mxu1  ;;  %v1405_v1 = vpop.f32.mrb[18].mxu0 }
 0x25b   : > { %v1444_v2 = vadd.f32 %v1443_v0, %v1442_v53  ;;  %v1445_v4 = vpop.f32.mrb[18].mxu1  ;;  %v1406_v5 = vpop.f32.mrb[19].mxu0 }
 0x25c   : > { %v1092_v6 = vadd.f32 %v1404_v21, %v2213_v52  ;;  %v1407_v42 = vadd.f32 %v1406_v5, %v1405_v1  ;;  %v1446_v62 = vpop.f32.mrb[19].mxu1 }
 0x25d   : > { %v1447_v8 = vadd.f32 %v1446_v62, %v1445_v4 }
 0x25e   : > { %v1157_v9 = vadd.f32 %v1444_v2, %v1092_v6  ;;  %v1095_v3 = vadd.f32 %v1407_v42, %v2213_v52 }
 0x260   : > { %1187 = vst [vmem:[%s2219_s12] sm:$0xff] %v1157_v9  ;;  %v1160_v12 = vadd.f32 %v1447_v8, %v1095_v3  ;;  %v1408_v41 = vpop.f32.mrb[20].mxu0 }
 0x261   : > { %v1448_v19 = vpop.f32.mrb[20].mxu1  ;;  %v1409_v13 = vpop.f32.mrb[21].mxu0 }
 0x262   : > { %1188 = vst [vmem:[%s2219_s12 + $0x8] sm:$0xff] %v1160_v12  ;;  %v1410_v17 = vadd.f32 %v1409_v13, %v1408_v41  ;;  %v1449_v18 = vpop.f32.mrb[21].mxu1  ;;  %v1411_v15 = vpop.f32.mrb[22].mxu0 }
 0x263   : > { %v1450_v43 = vadd.f32 %v1449_v18, %v1448_v19  ;;  %v1451_v23 = vpop.f32.mrb[22].mxu1  ;;  %v1412_v24 = vpop.f32.mrb[23].mxu0 }
 0x264   : > { %v1100_v26 = vadd.f32 %v1410_v17, %v2213_v52  ;;  %v1413_v27 = vadd.f32 %v1412_v24, %v1411_v15  ;;  %v1452_v10 = vpop.f32.mrb[23].mxu1 }
 0x265   : > { %v1453_v28 = vadd.f32 %v1452_v10, %v1451_v23 }
 0x266   : > { %v1165_v11 = vadd.f32 %v1450_v43, %v1100_v26  ;;  %v1103_v29 = vadd.f32 %v1413_v27, %v2213_v52 }
 0x268   : > { %1189 = vst [vmem:[%s2219_s12 + $0x10] sm:$0xff] %v1165_v11  ;;  %v1168_v30 = vadd.f32 %v1453_v28, %v1103_v29  ;;  %v1414_v14 = vpop.f32.mrb[24].mxu0 }
 0x269   : > { %v1454_v7 = vpop.f32.mrb[24].mxu1  ;;  %v1415_v31 = vpop.f32.mrb[25].mxu0 }
 0x26a   : > { %1190 = vst [vmem:[%s2219_s12 + $0x18] sm:$0xff] %v1168_v30  ;;  %v1416_v32 = vadd.f32 %v1415_v31, %v1414_v14  ;;  %v1455_v33 = vpop.f32.mrb[25].mxu1  ;;  %v1417_v34 = vpop.f32.mrb[26].mxu0 }
 0x26b   : > { %v1456_v35 = vadd.f32 %v1455_v33, %v1454_v7  ;;  %v1457_v36 = vpop.f32.mrb[26].mxu1  ;;  %v1418_v37 = vpop.f32.mrb[27].mxu0 }
 0x26c   : > { %v1108_v38 = vadd.f32 %v1416_v32, %v2213_v52  ;;  %v1419_v39 = vadd.f32 %v1418_v37, %v1417_v34  ;;  %v1458_v44 = vpop.f32.mrb[27].mxu1 }
 0x26d   : > { %v1459_v45 = vadd.f32 %v1458_v44, %v1457_v36 }
 0x26e   : > { %v1173_v46 = vadd.f32 %v1456_v35, %v1108_v38  ;;  %v1111_v60 = vadd.f32 %v1419_v39, %v2213_v52 }
 0x270   : > { %1191 = vst [vmem:[%s2219_s12 + $0x20] sm:$0xff] %v1173_v46  ;;  %v1176_v47 = vadd.f32 %v1459_v45, %v1111_v60  ;;  %v1420_v48 = vpop.f32.mrb[28].mxu0 }
 0x271   : > { %v1460_v61 = vpop.f32.mrb[28].mxu1  ;;  %v1421_v58 = vpop.f32.mrb[29].mxu0 }
 0x272   : > { %1192 = vst [vmem:[%s2219_s12 + $0x28] sm:$0xff] %v1176_v47  ;;  %v1422_v49 = vadd.f32 %v1421_v58, %v1420_v48  ;;  %v1461_v59 = vpop.f32.mrb[29].mxu1  ;;  %v1423_v51 = vpop.f32.mrb[30].mxu0 }
 0x273   : > { %v1462_v22 = vadd.f32 %v1461_v59, %v1460_v61  ;;  %v1463_v40 = vpop.f32.mrb[30].mxu1  ;;  %v1424_v16 = vpop.f32.mrb[31].mxu0 }
 0x274   : > { %v1116_v20 = vadd.f32 %v1422_v49, %v2213_v52  ;;  %v1425_v54 = vadd.f32 %v1424_v16, %v1423_v51  ;;  %v1464_v55 = vpop.f32.mrb[31].mxu1 }
 0x275   : > { %v1465_v25 = vadd.f32 %v1464_v55, %v1463_v40 }
 0x276   : > { %v1181_v57 = vadd.f32 %v1462_v22, %v1116_v20  ;;  %v1119_v63 = vadd.f32 %v1425_v54, %v2213_v52 }
 0x278   : > { %1193 = vst [vmem:[%s2219_s12 + $0x30] sm:$0xff] %v1181_v57  ;;  %v1184_v50 = vadd.f32 %v1465_v25, %v1119_v63 }
 0x27a   : > { %1194 = vst [vmem:[%s2219_s12 + $0x38] sm:$0xff] %v1184_v50 }
 0x27b   : > { %1753 = shalt.err (!%p1750_p2)
}
 0x27c   : > { %s1754_s6 = scalar_lea.hbm %s2240_s11, 1024  ;;  %s1758_s10 = scalar_lea.hbm %s2291_s5, 2048 }
 0x27d   : > { %p1755_p13 = scmp.ne.s32.totalorder %s2240_s11, %s1754_s6  ;;  %p1759_p4 = scmp.lt.u32.totalorder %s2240_s11, %s2291_s5 }
 0x27e   : > { %p1760_p7 = scmp.lt.u32.totalorder %s1758_s10, %s1754_s6  ;;  %p1762_p11 = scmp.lt.u32.totalorder %s1754_s6, %s2240_s11 }
 0x27f   : > { %p1756_p6 = pnand %p1755_p13, %p2305_p0 }
 0x280   : > { %p1761_p8 = por %p1760_p7, %p1759_p4 }
 0x281   : > { %p1757_p10 = pneg %p1756_p6 }
 0x282   : > { %p1763_p1 = por %p1762_p11, %p1761_p8 }
 0x284   : > { %p1764_p3 = pnand %p1763_p1, %p1757_p10 }
 0x286   : > { %1767 = shalt.err (!%p1764_p3)
}
 0x287   : > { %s1823_s29 = smov 128   ;;  %s1824_s8 = smov 8  }
 0x288   : > { %1476 = dma.vmem_to_hbm [thread:$0]  (%p2305_p0), %s2234_s13, 1024, %s2240_s11, %s1196_s14, %s1823_s29, %s1823_s29, %s1824_s8  }
 0x289 PF: > { %s1224_s9 = sand.u32 1, %s1798_s18   ;;  %p2306_p5 = scmp.ne.s32.totalorder %s2296_s25, 0 }
 0x28a   : > { %p2307_p9 = scmp.ge.s32.totalorder %s1810_s21, 2  ;;  %s1225_s15 = scalar_lea.sflag [#allocation4], %s1224_s9 }
 0x28c   : > { %p1490_p12 = pnand %p2307_p9, %p2306_p5 }
 0x28e   : > { %1793 = dma.done.wait (!%p1490_p12), %s1225_s15, 1024  }
 0x28f   : > { %1795 = vsyncadd (!%p1490_p12), %s1225_s15, 4294966272  ;;  %p19_p2 = scmp.ge.s32.totalorder %s1965_s16, 4   ;;  %s2308_s18 = smov %s1802_s19 }
 0x290   : > { %s2309_s19 = smov %s1806_s20  ;;  %s2310_s20 = smov %s1974_s27 }
 0x291   : > { %s2311_s21 = smov %s1965_s16  ;;  %21 = sbr.rel (!%p19_p2) target bundleno = 6 (0x6), region = 93 }
 0x298   :  { %1230 = vsyncpa [#allocation3], 1 }
 0x299   :  { %1232 = vsyncpa [#allocation3 + $0x1], 1 }
 0x29a   :  { %1233 = vsyncpa [#allocation6], 1 }
 0x29b   :  { %1234 = vsyncpa [#allocation4], 1 }
 0x29c   :  { %1236 = vsyncpa [#allocation4 + $0x1], 1 }

</bundles_post_ra>
